<compile_context>
chip_gen: v7x
topology: tpu7x:2x2x1
jax: 0.10.0
libtpu: 0.0.40
codegen_flags: <defaults>
</compile_context>

<pallas_src>
import functools
import math

import jax
import jax.numpy as jnp
import numpy as np
from jax import lax
from jax.experimental import pallas as pl
from jax.experimental.pallas import tpu as pltpu

EPS = 1e-6
MASK_COEF = -1e12  # matches torch.masked_fill(mask == 0, -1e12)
LANE = 128


# ----------------------------- shared math ---------------------------------
def _layernorm(v, g, b, eps=EPS):
    mu = jnp.mean(v, axis=-1, keepdims=True)
    var = jnp.mean((v - mu) ** 2, axis=-1, keepdims=True)
    return (v - mu) * lax.rsqrt(var + eps) * g + b


def _gelu_exact(x):
    # nn.GELU() default = exact erf formulation
    return 0.5 * x * (1.0 + lax.erf(x / jnp.sqrt(2.0).astype(x.dtype)))


# ----------------------------- fused Pallas kernel ---------------------------
# Packed per-layer vector rows (lvec, each row zero-padded to LANE columns):
#   0: ln1_g   1: ln1_b   2: bqkv (3*H*A)   3: bp
#   4: ln2_g   5: ln2_b   6: b1 (F)         7: b2
# Packed final vector rows (fvec): 0: norm_g   1: norm_b   2: bproj (O padded)
def fused_encoder_kernel(x_ref, bias_ref, lvec_ref, wqkv_ref, wp_ref,
                         w1_ref, w2_ref, fvec_ref, wproj_ref,
                         o_ref, acc_ref,
                         *, head_count, abstract_dim, dim, ffw_dim):
    l = pl.program_id(0)

    # Initialize the resident residual stream from the embedded input once.
    @pl.when(l == 0)
    def _():
        acc_ref[...] = x_ref[...]

    x = acc_ref[...]                 # (BS, D) f32 residual stream (VMEM-resident)
    bias = bias_ref[...]             # (BS, BS) block-diagonal additive mask bias
    vec = lvec_ref[0]                # (8, LANE) packed per-layer vectors

    D, A, H, F = dim, abstract_dim, head_count, ffw_dim
    HA = H * A
    inv_scale = 1.0 / math.sqrt(A)

    ln1_g, ln1_b = vec[0:1, 0:D], vec[1:2, 0:D]
    bqkv = vec[2:3, 0:3 * HA]
    bp = vec[3:4, 0:D]
    ln2_g, ln2_b = vec[4:5, 0:D], vec[5:6, 0:D]
    b1 = vec[6:7, 0:F]
    b2 = vec[7:8, 0:D]

    # --- ResidualConnectionGroup 1: x + Attn(LN(x)) ---
    xn_b = _layernorm(x, ln1_g, ln1_b).astype(jnp.bfloat16)
    qkv = jnp.dot(xn_b, wqkv_ref[0],
                  preferred_element_type=jnp.float32) + bqkv         # (BS, 3*H*A)
    q_all = qkv[:, 0:HA] * inv_scale     # fold 1/sqrt(A) into q
    k_all = qkv[:, HA:2 * HA]
    v_all = qkv[:, 2 * HA:3 * HA]

    head_outs = []
    for h in range(H):                   # tiny static unroll over heads
        sl = slice(h * A, (h + 1) * A)
        q_h = q_all[:, sl].astype(jnp.bfloat16)
        k_h = k_all[:, sl].astype(jnp.bfloat16)
        v_h = v_all[:, sl].astype(jnp.bfloat16)
        # scores: contract last dims (no in-kernel reshapes); batch handled by
        # the block-diagonal bias (cross-batch entries get -1e12 -> softmax 0).
        s = lax.dot_general(q_h, k_h, (((1,), (1,)), ((), ())),
                            preferred_element_type=jnp.float32) + bias  # (BS, BS)
        s = s - jnp.max(s, axis=-1, keepdims=True)
        e = jnp.exp(s)
        p = e * pl.reciprocal(jnp.sum(e, axis=-1, keepdims=True), approx=True)
        head_outs.append(jnp.dot(p.astype(jnp.bfloat16), v_h,
                                 preferred_element_type=jnp.float32))   # (BS, A)

    attn_in = jnp.concatenate(head_outs, axis=-1).astype(jnp.bfloat16)  # (BS, HA)
    attn = jnp.dot(attn_in, wp_ref[0], preferred_element_type=jnp.float32)
    x1 = x + attn + bp               # dropout is an inference no-op

    # --- ResidualConnectionGroup 2: x + FFN(LN(x)) ---
    xn2_b = _layernorm(x1, ln2_g, ln2_b).astype(jnp.bfloat16)
    h1 = _gelu_exact(jnp.dot(xn2_b, w1_ref[0],
                             preferred_element_type=jnp.float32) + b1)
    x2 = x1 + jnp.dot(h1.astype(jnp.bfloat16), w2_ref[0],
                      preferred_element_type=jnp.float32) + b2
    acc_ref[...] = x2

    # --- final LayerNorm + ProjectionLayer (output padded to LANE columns) ---
    @pl.when(l == pl.num_programs(0) - 1)
    def _():
        fvec = fvec_ref[...]
        xnf_b = _layernorm(x2, fvec[0:1, 0:D], fvec[1:2, 0:D]).astype(jnp.bfloat16)
        o_ref[...] = jnp.dot(xnf_b, wproj_ref[...],
                             preferred_element_type=jnp.float32) + fvec[2:3, :]


# ----------------------------- packing & wrapper ------------------------------
def _pad_lanes(v, width=LANE):
    n = v.shape[-1]
    return jnp.pad(v, [(0, 0)] * (v.ndim - 1) + [(0, width - n)])


def pack_kernel_params(params, cfg):
    """Pack natural per-layer params into the lane-dense kernel layout."""
    O = params["wproj"].shape[-1]
    O_pad = ((O + LANE - 1) // LANE) * LANE
    assert O_pad == LANE, "bproj row packing assumes output_dim <= 128"

    wqkv = jnp.concatenate([params["wq"], params["wk"], params["wv"]],
                           axis=-1).astype(jnp.bfloat16)           # (NB, D, 3*H*A)
    bqkv = jnp.concatenate([params["bq"], params["bk"], params["bv"]], axis=-1)

    rows = [params["ln1_g"], params["ln1_b"], bqkv, params["bp"],
            params["ln2_g"], params["ln2_b"], params["b1"], params["b2"]]
    lvec = jnp.stack([_pad_lanes(r) for r in rows], axis=1)         # (NB, 8, LANE)

    fvec = jnp.pad(jnp.stack([_pad_lanes(params["norm_g"]),
                              _pad_lanes(params["norm_b"]),
                              _pad_lanes(params["bproj"])], axis=0),
                   ((0, 5), (0, 0)))                                 # (8, LANE)

    return dict(
        lvec=lvec,
        wqkv=wqkv,
        wp=params["wp"].astype(jnp.bfloat16),
        w1=params["w1"].astype(jnp.bfloat16),
        w2=params["w2"].astype(jnp.bfloat16),
        fvec=fvec,
        wproj=jnp.pad(params["wproj"],
                      ((0, 0), (0, O_pad - O))).astype(jnp.bfloat16),  # zero cols
    )


def run_fused_network(x2d, bias, kp, cfg):
    BS, D = x2d.shape
    L = cfg["n_blocks"]
    O_pad = kp["wproj"].shape[-1]

    def layer_spec(shape):
        return pl.BlockSpec((1,) + tuple(shape[1:]),
                            lambda l, n=len(shape): (l,) + (0,) * (n - 1))

    def const_spec(shape):
        return pl.BlockSpec(tuple(shape), lambda l, n=len(shape): (0,) * n)

    kern = functools.partial(fused_encoder_kernel,
                             head_count=cfg["head_count"],
                             abstract_dim=cfg["attn_abstract_dim"],
                             dim=D, ffw_dim=cfg["ffw_abstract_dim"])
    return pl.pallas_call(
        kern,
        out_shape=jax.ShapeDtypeStruct((BS, O_pad), jnp.float32),
        grid=(L,),
        in_specs=[const_spec(x2d.shape), const_spec(bias.shape),
                  layer_spec(kp["lvec"].shape), layer_spec(kp["wqkv"].shape),
                  layer_spec(kp["wp"].shape), layer_spec(kp["w1"].shape),
                  layer_spec(kp["w2"].shape),
                  const_spec(kp["fvec"].shape), const_spec(kp["wproj"].shape)],
        out_specs=const_spec((BS, O_pad)),
        scratch_shapes=[pltpu.VMEM((BS, D), jnp.float32)],
        compiler_params=pltpu.CompilerParams(
            dimension_semantics=("arbitrary",)),   # sequential: carries acc_ref
    )(x2d, bias, kp["lvec"], kp["wqkv"], kp["wp"], kp["w1"], kp["w2"],
      kp["fvec"], kp["wproj"])


def encoder_only_transformer(tokens, mask, params, cfg):
    D, O = cfg["dim"], cfg["output_dim"]
    B, S = tokens.shape
    # InputEmbeddings: sqrt(dim) * embedding(x)            (glue: gather)
    x = math.sqrt(D) * jnp.take(params["embedding"], tokens, axis=0)
    # PositionalEmbeddings: x + pos[:, :S]                 (glue: table lookup)
    x = x + params["pos_embedding"][:, :S]
    x2d = x.reshape(B * S, D).astype(jnp.float32)

    # Batch folded into rows: block-diagonal (BS, BS) additive bias.
    # (A fully-masked row gives a uniform distribution, matching torch
    #  masked_fill(-1e12) + softmax behaviour.)
    b_row = jnp.repeat(jnp.arange(B), S)
    s_row = jnp.tile(jnp.arange(S), B)
    same_batch = b_row[:, None] == b_row[None, :]
    within = jnp.where(mask[b_row[:, None], s_row[:, None], s_row[None, :]] == 0,
                       jnp.float32(MASK_COEF), jnp.float32(0.0))
    bias = jnp.where(same_batch, within, jnp.float32(MASK_COEF))   # (BS, BS)

    kp = pack_kernel_params(params, cfg)
    out2d = run_fused_network(x2d, bias, kp, cfg)                   # (BS, O_pad)
    return out2d[:, :O].reshape(B, S, O)


# ----------------------------- parameters -----------------------------------
def init_params(key, cfg):
    D, A, F = cfg["dim"], cfg["attn_abstract_dim"], cfg["ffw_abstract_dim"]
    H, V = cfg["head_count"], cfg["vocab_size"]
    Lc, O, NB = cfg["context_length"], cfg["output_dim"], cfg["n_blocks"]
    HA = H * A
    keys = iter(jax.random.split(key, 40))

    def unif(shape, fan_in):
        bound = 1.0 / math.sqrt(fan_in)
        return jax.random.uniform(next(keys), shape, jnp.float32, -bound, bound)

    params = {"embedding": jax.random.normal(next(keys), (V, D), jnp.float32)}

    # sinusoidal positional table (exact replication of PositionalEmbeddings.__init__)
    dims = jnp.arange(1, D + 1, dtype=jnp.float32)
    positions = jnp.arange(1, Lc + 1, dtype=jnp.float32)[:, None]
    encoding_base = 2.0 * math.pi * jnp.exp(jnp.log(jnp.float32(Lc)) * -(dims / D))
    pe = jnp.zeros((Lc, D), jnp.float32)
    pe = pe.at[0::2].set(jnp.sin(positions[0::2] * encoding_base))
    pe = pe.at[1::2].set(jnp.cos(positions[1::2] * encoding_base))
    params["pos_embedding"] = pe[None]

    # natural (torch-like) per-layer parameters, stacked on a leading NB axis;
    # QKV output columns are head-major, matching the torch .view/.permute.
    params.update(
        ln1_g=jnp.ones((NB, D), jnp.float32), ln1_b=jnp.zeros((NB, D), jnp.float32),
        wq=unif((NB, D, HA), D), bq=unif((NB, HA), D),
        wk=unif((NB, D, HA), D), bk=unif((NB, HA), D),
        wv=unif((NB, D, HA), D), bv=unif((NB, HA), D),
        wp=unif((NB, HA, D), HA), bp=unif((NB, D), HA),
        ln2_g=jnp.ones((NB, D), jnp.float32), ln2_b=jnp.zeros((NB, D), jnp.float32),
        w1=unif((NB, D, F), D), b1=unif((NB, F), D),
        w2=unif((NB, F, D), F), b2=unif((NB, D), F),
        norm_g=jnp.ones((D,), jnp.float32), norm_b=jnp.zeros((D,), jnp.float32),
        wproj=unif((D, O), D), bproj=unif((O,), D),
    )
    return params


# ----------------------------- pure-JAX reference ----------------------------
def reference_forward(tokens, mask, params, cfg):
    D, A, H, NB = (cfg["dim"], cfg["attn_abstract_dim"],
                   cfg["head_count"], cfg["n_blocks"])
    B, S = tokens.shape
    x = math.sqrt(D) * jnp.take(params["embedding"], tokens, axis=0)
    x = x + params["pos_embedding"][:, :S]
    m4 = mask[:, None, :, :]                     # broadcast over heads

    def split_heads(v):                          # (B,S,H*A) -> (B,H,S,A)
        return v.reshape(B, S, H, A).transpose(0, 2, 1, 3)

    for l in range(NB):
        xn = _layernorm(x, params["ln1_g"][l], params["ln1_b"][l])
        q = split_heads(xn @ params["wq"][l] + params["bq"][l])
        k = split_heads(xn @ params["wk"][l] + params["bk"][l])
        v = split_heads(xn @ params["wv"][l] + params["bv"][l])
        s = jnp.einsum("bhqa,bhka->bhqk", q, k) / math.sqrt(A)
        s = jnp.where(m4 == 0, MASK_COEF, s)
        w = jax.nn.softmax(s, axis=-1)
        o = jnp.einsum("bhqk,bhka->bhqa", w, v)
        o = o.transpose(0, 2, 1, 3).reshape(B, S, H * A)
        x = x + o @ params["wp"][l] + params["bp"][l]
        xn2 = _layernorm(x, params["ln2_g"][l], params["ln2_b"][l])
        h1 = _gelu_exact(xn2 @ params["w1"][l] + params["b1"][l])
        x = x + h1 @ params["w2"][l] + params["b2"][l]
    xn = _layernorm(x, params["norm_g"], params["norm_b"])
    return xn @ params["wproj"] + params["bproj"]


# ----------------------------- main ------------------------------------------
if __name__ == "__main__":
    cfg = dict(
        vocab_size=50,
        dim=32,
        context_length=16,
        head_count=2,
        attn_abstract_dim=int(32 * 0.5),   # abstraction_coef = 0.5
        ffw_abstract_dim=int(32 * 2.0),    # abstraction_coef = 2.0
        n_blocks=2,
        output_dim=50,
    )
    B, S = 2, cfg["context_length"]

    root = jax.random.PRNGKey(0)
    k_par, k_tok = jax.random.split(root)
    params = init_params(k_par, cfg)

    tokens = jax.random.randint(k_tok, (B, S), 0, cfg["vocab_size"], dtype=jnp.int32)
    # attention mask: batch 1 masks out the last 3 key positions
    mask = jnp.ones((B, S, S), jnp.int32).at[1, :, -3:].set(0)

    out = jax.block_until_ready(encoder_only_transformer(tokens, mask, params, cfg))
    assert out.shape == (B, S, cfg["output_dim"]) and out.dtype == jnp.float32

    ref = jax.block_until_ready(reference_forward(tokens, mask, params, cfg))
    np.testing.assert_allclose(np.asarray(out), np.asarray(ref), rtol=2e-2, atol=2e-2)

    print("KERNEL_OK")
</pallas_src>

<mosaic_0001>
module attributes {stable_mosaic.version = 11 : i64} {
  func.func @fused_encoder_kernel(%arg0: i32, %arg1: memref<32x32xf32, #tpu.memory_space<vmem>>, %arg2: memref<32x32xf32, #tpu.memory_space<vmem>>, %arg3: memref<1x8x128xf32, #tpu.memory_space<vmem>>, %arg4: memref<1x32x96xbf16, #tpu.memory_space<vmem>>, %arg5: memref<1x32x32xbf16, #tpu.memory_space<vmem>>, %arg6: memref<1x32x64xbf16, #tpu.memory_space<vmem>>, %arg7: memref<1x64x32xbf16, #tpu.memory_space<vmem>>, %arg8: memref<8x128xf32, #tpu.memory_space<vmem>>, %arg9: memref<32x128xbf16, #tpu.memory_space<vmem>>, %arg10: memref<32x128xf32, #tpu.memory_space<vmem>>, %arg11: memref<32x32xf32, #tpu.memory_space<vmem>>) attributes {dimension_semantics = [#tpu.dimension_semantics<arbitrary>], iteration_bounds = array<i64: 2>, scalar_prefetch = 0 : i64, scratch_operands = 1 : i64, tpu.core_type = #tpu.core_type<tc>, window_params = [{pipeline_mode = #tpu.pipeline_mode<synchronous>, transform_indices = @transform_0, window_bounds = array<i64: 32, 32>}, {pipeline_mode = #tpu.pipeline_mode<synchronous>, transform_indices = @transform_1, window_bounds = array<i64: 32, 32>}, {transform_indices = @transform_2, window_bounds = array<i64: 1, 8, 128>}, {transform_indices = @transform_3, window_bounds = array<i64: 1, 32, 96>}, {transform_indices = @transform_4, window_bounds = array<i64: 1, 32, 32>}, {transform_indices = @transform_5, window_bounds = array<i64: 1, 32, 64>}, {transform_indices = @transform_6, window_bounds = array<i64: 1, 64, 32>}, {pipeline_mode = #tpu.pipeline_mode<synchronous>, transform_indices = @transform_7, window_bounds = array<i64: 8, 128>}, {pipeline_mode = #tpu.pipeline_mode<synchronous>, transform_indices = @transform_8, window_bounds = array<i64: 32, 128>}, {pipeline_mode = #tpu.pipeline_mode<synchronous>, transform_indices = @transform_9, window_bounds = array<i64: 32, 128>}]} {
    %c0_i32 = arith.constant 0 : i32
    %0 = arith.cmpi eq, %arg0, %c0_i32 : i32
    %1 = arith.extui %0 : i1 to i32
    %c0_i32_0 = arith.constant 0 : i32
    %2 = arith.cmpi ne, %1, %c0_i32_0 : i32
    scf.if %2 {
      %c0_47 = arith.constant 0 : index
      %c0_48 = arith.constant 0 : index
      %144 = vector.load %arg1[%c0_47, %c0_48] : memref<32x32xf32, #tpu.memory_space<vmem>>, vector<32x32xf32>
      %c0_49 = arith.constant 0 : index
      %c0_50 = arith.constant 0 : index
      %145 = vector.load %arg11[%c0_49, %c0_50] : memref<32x32xf32, #tpu.memory_space<vmem>>, vector<32x32xf32>
      tpu.vector_store %arg11[%c0_49, %c0_50], %144 {strides = array<i32>} : memref<32x32xf32, #tpu.memory_space<vmem>>, vector<32x32xf32>,
    } else {
    }
    %c0 = arith.constant 0 : index
    %c0_1 = arith.constant 0 : index
    %3 = vector.load %arg11[%c0, %c0_1] : memref<32x32xf32, #tpu.memory_space<vmem>>, vector<32x32xf32>
    %c0_2 = arith.constant 0 : index
    %c0_3 = arith.constant 0 : index
    %4 = vector.load %arg2[%c0_2, %c0_3] : memref<32x32xf32, #tpu.memory_space<vmem>>, vector<32x32xf32>
    %c0_4 = arith.constant 0 : index
    %c0_5 = arith.constant 0 : index
    %c0_6 = arith.constant 0 : index
    %5 = vector.load %arg3[%c0_4, %c0_5, %c0_6] : memref<1x8x128xf32, #tpu.memory_space<vmem>>, vector<1x8x128xf32>
    %6 = vector.shape_cast %5 : vector<1x8x128xf32> to vector<8x128xf32>
    %7 = vector.extract_strided_slice %6 {offsets = [0, 0], sizes = [1, 32], strides = [1, 1]} : vector<8x128xf32> to vector<1x32xf32>
    %8 = vector.extract_strided_slice %6 {offsets = [1, 0], sizes = [1, 32], strides = [1, 1]} : vector<8x128xf32> to vector<1x32xf32>
    %9 = vector.extract_strided_slice %6 {offsets = [2, 0], sizes = [1, 96], strides = [1, 1]} : vector<8x128xf32> to vector<1x96xf32>
    %10 = vector.extract_strided_slice %6 {offsets = [3, 0], sizes = [1, 32], strides = [1, 1]} : vector<8x128xf32> to vector<1x32xf32>
    %11 = vector.extract_strided_slice %6 {offsets = [4, 0], sizes = [1, 32], strides = [1, 1]} : vector<8x128xf32> to vector<1x32xf32>
    %12 = vector.extract_strided_slice %6 {offsets = [5, 0], sizes = [1, 32], strides = [1, 1]} : vector<8x128xf32> to vector<1x32xf32>
    %13 = vector.extract_strided_slice %6 {offsets = [6, 0], sizes = [1, 64], strides = [1, 1]} : vector<8x128xf32> to vector<1x64xf32>
    %14 = vector.extract_strided_slice %6 {offsets = [7, 0], sizes = [1, 32], strides = [1, 1]} : vector<8x128xf32> to vector<1x32xf32>
    %cst = arith.constant dense<0.000000e+00> : vector<32xf32>
    %15 = vector.multi_reduction <add>, %3, %cst [1] : vector<32x32xf32> to vector<32xf32>
    %16 = vector.shape_cast %15 : vector<32xf32> to vector<32x1xf32>
    %cst_7 = arith.constant 3.200000e+01 : f32
    %17 = vector.broadcast %cst_7 : f32 to vector<32x1xf32>
    %18 = arith.divf %16, %17 : vector<32x1xf32>
    %19 = vector.broadcast %18 : vector<32x1xf32> to vector<32x32xf32>
    %20 = arith.subf %3, %19 : vector<32x32xf32>
    %21 = arith.mulf %20, %20 : vector<32x32xf32>
    %cst_8 = arith.constant dense<0.000000e+00> : vector<32xf32>
    %22 = vector.multi_reduction <add>, %21, %cst_8 [1] : vector<32x32xf32> to vector<32xf32>
    %23 = vector.shape_cast %22 : vector<32xf32> to vector<32x1xf32>
    %cst_9 = arith.constant 3.200000e+01 : f32
    %24 = vector.broadcast %cst_9 : f32 to vector<32x1xf32>
    %25 = arith.divf %23, %24 : vector<32x1xf32>
    %26 = vector.broadcast %18 : vector<32x1xf32> to vector<32x32xf32>
    %27 = arith.subf %3, %26 : vector<32x32xf32>
    %cst_10 = arith.constant 9.99999997E-7 : f32
    %28 = vector.broadcast %cst_10 : f32 to vector<32x1xf32>
    %29 = arith.addf %25, %28 : vector<32x1xf32>
    %30 = math.rsqrt %29 : vector<32x1xf32>
    %31 = vector.broadcast %30 : vector<32x1xf32> to vector<32x32xf32>
    %32 = arith.mulf %27, %31 : vector<32x32xf32>
    %33 = vector.broadcast %7 : vector<1x32xf32> to vector<32x32xf32>
    %34 = arith.mulf %32, %33 : vector<32x32xf32>
    %35 = vector.broadcast %8 : vector<1x32xf32> to vector<32x32xf32>
    %36 = arith.addf %34, %35 : vector<32x32xf32>
    %37 = arith.truncf %36 : vector<32x32xf32> to vector<32x32xbf16>
    %c0_11 = arith.constant 0 : index
    %c0_12 = arith.constant 0 : index
    %c0_13 = arith.constant 0 : index
    %38 = vector.load %arg4[%c0_11, %c0_12, %c0_13] : memref<1x32x96xbf16, #tpu.memory_space<vmem>>, vector<1x32x96xbf16>
    %39 = vector.shape_cast %38 : vector<1x32x96xbf16> to vector<32x96xbf16>
    %cst_14 = arith.constant dense<0.000000e+00> : vector<32x96xf32>
    %40 = tpu.matmul %37, %39, %cst_14 {dimension_numbers = #tpu.dot_dimension_numbers<[1], [0], [0], [1], [0, 0, 1, 1], [], []>} : vector<32x32xbf16>, vector<32x96xbf16>, vector<32x96xf32> -> vector<32x96xf32>
    %41 = vector.broadcast %9 : vector<1x96xf32> to vector<32x96xf32>
    %42 = arith.addf %40, %41 : vector<32x96xf32>
    %43 = vector.extract_strided_slice %42 {offsets = [0, 0], sizes = [32, 32], strides = [1, 1]} : vector<32x96xf32> to vector<32x32xf32>
    %cst_15 = arith.constant 2.500000e-01 : f32
    %44 = vector.broadcast %cst_15 : f32 to vector<32x32xf32>
    %45 = arith.mulf %43, %44 : vector<32x32xf32>
    %46 = vector.extract_strided_slice %42 {offsets = [0, 32], sizes = [32, 32], strides = [1, 1]} : vector<32x96xf32> to vector<32x32xf32>
    %47 = vector.extract_strided_slice %42 {offsets = [0, 64], sizes = [32, 32], strides = [1, 1]} : vector<32x96xf32> to vector<32x32xf32>
    %48 = vector.extract_strided_slice %45 {offsets = [0, 0], sizes = [32, 16], strides = [1, 1]} : vector<32x32xf32> to vector<32x16xf32>
    %49 = arith.truncf %48 : vector<32x16xf32> to vector<32x16xbf16>
    %50 = vector.extract_strided_slice %46 {offsets = [0, 0], sizes = [32, 16], strides = [1, 1]} : vector<32x32xf32> to vector<32x16xf32>
    %51 = arith.truncf %50 : vector<32x16xf32> to vector<32x16xbf16>
    %52 = vector.extract_strided_slice %47 {offsets = [0, 0], sizes = [32, 16], strides = [1, 1]} : vector<32x32xf32> to vector<32x16xf32>
    %53 = arith.truncf %52 : vector<32x16xf32> to vector<32x16xbf16>
    %cst_16 = arith.constant dense<0.000000e+00> : vector<32x32xf32>
    %54 = tpu.matmul %49, %51, %cst_16 {dimension_numbers = #tpu.dot_dimension_numbers<[1], [1], [0], [0], [0, 0, 1, 0], [], []>} : vector<32x16xbf16>, vector<32x16xbf16>, vector<32x32xf32> -> vector<32x32xf32>
    %55 = arith.addf %54, %4 : vector<32x32xf32>
    %cst_17 = arith.constant dense<0xFF800000> : vector<32xf32>
    %56 = vector.multi_reduction <maximumf>, %55, %cst_17 [1] : vector<32x32xf32> to vector<32xf32>
    %57 = vector.shape_cast %56 : vector<32xf32> to vector<32x1xf32>
    %58 = vector.broadcast %57 : vector<32x1xf32> to vector<32x32xf32>
    %59 = arith.subf %55, %58 : vector<32x32xf32>
    %60 = math.exp %59 : vector<32x32xf32>
    %cst_18 = arith.constant dense<0.000000e+00> : vector<32xf32>
    %61 = vector.multi_reduction <add>, %60, %cst_18 [1] : vector<32x32xf32> to vector<32xf32>
    %62 = vector.shape_cast %61 : vector<32xf32> to vector<32x1xf32>
    %63 = tpu.reciprocal %62 {approx = true} : vector<32x1xf32> -> vector<32x1xf32>
    %64 = vector.broadcast %63 : vector<32x1xf32> to vector<32x32xf32>
    %65 = arith.mulf %60, %64 : vector<32x32xf32>
    %66 = arith.truncf %65 : vector<32x32xf32> to vector<32x32xbf16>
    %cst_19 = arith.constant dense<0.000000e+00> : vector<32x16xf32>
    %67 = tpu.matmul %66, %53, %cst_19 {dimension_numbers = #tpu.dot_dimension_numbers<[1], [0], [0], [1], [0, 0, 1, 1], [], []>} : vector<32x32xbf16>, vector<32x16xbf16>, vector<32x16xf32> -> vector<32x16xf32>
    %68 = vector.extract_strided_slice %45 {offsets = [0, 16], sizes = [32, 16], strides = [1, 1]} : vector<32x32xf32> to vector<32x16xf32>
    %69 = arith.truncf %68 : vector<32x16xf32> to vector<32x16xbf16>
    %70 = vector.extract_strided_slice %46 {offsets = [0, 16], sizes = [32, 16], strides = [1, 1]} : vector<32x32xf32> to vector<32x16xf32>
    %71 = arith.truncf %70 : vector<32x16xf32> to vector<32x16xbf16>
    %72 = vector.extract_strided_slice %47 {offsets = [0, 16], sizes = [32, 16], strides = [1, 1]} : vector<32x32xf32> to vector<32x16xf32>
    %73 = arith.truncf %72 : vector<32x16xf32> to vector<32x16xbf16>
    %cst_20 = arith.constant dense<0.000000e+00> : vector<32x32xf32>
    %74 = tpu.matmul %69, %71, %cst_20 {dimension_numbers = #tpu.dot_dimension_numbers<[1], [1], [0], [0], [0, 0, 1, 0], [], []>} : vector<32x16xbf16>, vector<32x16xbf16>, vector<32x32xf32> -> vector<32x32xf32>
    %75 = arith.addf %74, %4 : vector<32x32xf32>
    %cst_21 = arith.constant dense<0xFF800000> : vector<32xf32>
    %76 = vector.multi_reduction <maximumf>, %75, %cst_21 [1] : vector<32x32xf32> to vector<32xf32>
    %77 = vector.shape_cast %76 : vector<32xf32> to vector<32x1xf32>
    %78 = vector.broadcast %77 : vector<32x1xf32> to vector<32x32xf32>
    %79 = arith.subf %75, %78 : vector<32x32xf32>
    %80 = math.exp %79 : vector<32x32xf32>
    %cst_22 = arith.constant dense<0.000000e+00> : vector<32xf32>
    %81 = vector.multi_reduction <add>, %80, %cst_22 [1] : vector<32x32xf32> to vector<32xf32>
    %82 = vector.shape_cast %81 : vector<32xf32> to vector<32x1xf32>
    %83 = tpu.reciprocal %82 {approx = true} : vector<32x1xf32> -> vector<32x1xf32>
    %84 = vector.broadcast %83 : vector<32x1xf32> to vector<32x32xf32>
    %85 = arith.mulf %80, %84 : vector<32x32xf32>
    %86 = arith.truncf %85 : vector<32x32xf32> to vector<32x32xbf16>
    %cst_23 = arith.constant dense<0.000000e+00> : vector<32x16xf32>
    %87 = tpu.matmul %86, %73, %cst_23 {dimension_numbers = #tpu.dot_dimension_numbers<[1], [0], [0], [1], [0, 0, 1, 1], [], []>} : vector<32x32xbf16>, vector<32x16xbf16>, vector<32x16xf32> -> vector<32x16xf32>
    %88 = tpu.concatenate %67, %87 in 1 : vector<32x16xf32>, vector<32x16xf32> -> vector<32x32xf32>
    %89 = arith.truncf %88 : vector<32x32xf32> to vector<32x32xbf16>
    %c0_24 = arith.constant 0 : index
    %c0_25 = arith.constant 0 : index
    %c0_26 = arith.constant 0 : index
    %90 = vector.load %arg5[%c0_24, %c0_25, %c0_26] : memref<1x32x32xbf16, #tpu.memory_space<vmem>>, vector<1x32x32xbf16>
    %91 = vector.shape_cast %90 : vector<1x32x32xbf16> to vector<32x32xbf16>
    %cst_27 = arith.constant dense<0.000000e+00> : vector<32x32xf32>
    %92 = tpu.matmul %89, %91, %cst_27 {dimension_numbers = #tpu.dot_dimension_numbers<[1], [0], [0], [1], [0, 0, 1, 1], [], []>} : vector<32x32xbf16>, vector<32x32xbf16>, vector<32x32xf32> -> vector<32x32xf32>
    %93 = arith.addf %3, %92 : vector<32x32xf32>
    %94 = vector.broadcast %10 : vector<1x32xf32> to vector<32x32xf32>
    %95 = arith.addf %93, %94 : vector<32x32xf32>
    %cst_28 = arith.constant dense<0.000000e+00> : vector<32xf32>
    %96 = vector.multi_reduction <add>, %95, %cst_28 [1] : vector<32x32xf32> to vector<32xf32>
    %97 = vector.shape_cast %96 : vector<32xf32> to vector<32x1xf32>
    %cst_29 = arith.constant 3.200000e+01 : f32
    %98 = vector.broadcast %cst_29 : f32 to vector<32x1xf32>
    %99 = arith.divf %97, %98 : vector<32x1xf32>
    %100 = vector.broadcast %99 : vector<32x1xf32> to vector<32x32xf32>
    %101 = arith.subf %95, %100 : vector<32x32xf32>
    %102 = arith.mulf %101, %101 : vector<32x32xf32>
    %cst_30 = arith.constant dense<0.000000e+00> : vector<32xf32>
    %103 = vector.multi_reduction <add>, %102, %cst_30 [1] : vector<32x32xf32> to vector<32xf32>
    %104 = vector.shape_cast %103 : vector<32xf32> to vector<32x1xf32>
    %cst_31 = arith.constant 3.200000e+01 : f32
    %105 = vector.broadcast %cst_31 : f32 to vector<32x1xf32>
    %106 = arith.divf %104, %105 : vector<32x1xf32>
    %107 = vector.broadcast %99 : vector<32x1xf32> to vector<32x32xf32>
    %108 = arith.subf %95, %107 : vector<32x32xf32>
    %cst_32 = arith.constant 9.99999997E-7 : f32
    %109 = vector.broadcast %cst_32 : f32 to vector<32x1xf32>
    %110 = arith.addf %106, %109 : vector<32x1xf32>
    %111 = math.rsqrt %110 : vector<32x1xf32>
    %112 = vector.broadcast %111 : vector<32x1xf32> to vector<32x32xf32>
    %113 = arith.mulf %108, %112 : vector<32x32xf32>
    %114 = vector.broadcast %11 : vector<1x32xf32> to vector<32x32xf32>
    %115 = arith.mulf %113, %114 : vector<32x32xf32>
    %116 = vector.broadcast %12 : vector<1x32xf32> to vector<32x32xf32>
    %117 = arith.addf %115, %116 : vector<32x32xf32>
    %118 = arith.truncf %117 : vector<32x32xf32> to vector<32x32xbf16>
    %c0_33 = arith.constant 0 : index
    %c0_34 = arith.constant 0 : index
    %c0_35 = arith.constant 0 : index
    %119 = vector.load %arg6[%c0_33, %c0_34, %c0_35] : memref<1x32x64xbf16, #tpu.memory_space<vmem>>, vector<1x32x64xbf16>
    %120 = vector.shape_cast %119 : vector<1x32x64xbf16> to vector<32x64xbf16>
    %cst_36 = arith.constant dense<0.000000e+00> : vector<32x64xf32>
    %121 = tpu.matmul %118, %120, %cst_36 {dimension_numbers = #tpu.dot_dimension_numbers<[1], [0], [0], [1], [0, 0, 1, 1], [], []>} : vector<32x32xbf16>, vector<32x64xbf16>, vector<32x64xf32> -> vector<32x64xf32>
    %122 = vector.broadcast %13 : vector<1x64xf32> to vector<32x64xf32>
    %123 = arith.addf %121, %122 : vector<32x64xf32>
    %cst_37 = arith.constant 5.000000e-01 : f32
    %124 = vector.broadcast %cst_37 : f32 to vector<32x64xf32>
    %125 = arith.mulf %124, %123 : vector<32x64xf32>
    %cst_38 = arith.constant 2.000000e+00 : f32
    %126 = math.sqrt %cst_38 : f32
    %127 = vector.broadcast %126 : f32 to vector<32x64xf32>
    %128 = arith.divf %123, %127 : vector<32x64xf32>
    %129 = math.erf %128 : vector<32x64xf32>
    %cst_39 = arith.constant 1.000000e+00 : f32
    %130 = vector.broadcast %cst_39 : f32 to vector<32x64xf32>
    %131 = arith.addf %130, %129 : vector<32x64xf32>
    %132 = arith.mulf %125, %131 : vector<32x64xf32>
    %133 = arith.truncf %132 : vector<32x64xf32> to vector<32x64xbf16>
    %c0_40 = arith.constant 0 : index
    %c0_41 = arith.constant 0 : index
    %c0_42 = arith.constant 0 : index
    %134 = vector.load %arg7[%c0_40, %c0_41, %c0_42] : memref<1x64x32xbf16, #tpu.memory_space<vmem>>, vector<1x64x32xbf16>
    %135 = vector.shape_cast %134 : vector<1x64x32xbf16> to vector<64x32xbf16>
    %cst_43 = arith.constant dense<0.000000e+00> : vector<32x32xf32>
    %136 = tpu.matmul %133, %135, %cst_43 {dimension_numbers = #tpu.dot_dimension_numbers<[1], [0], [0], [1], [0, 0, 1, 1], [], []>} : vector<32x64xbf16>, vector<64x32xbf16>, vector<32x32xf32> -> vector<32x32xf32>
    %137 = arith.addf %95, %136 : vector<32x32xf32>
    %138 = vector.broadcast %14 : vector<1x32xf32> to vector<32x32xf32>
    %139 = arith.addf %137, %138 : vector<32x32xf32>
    %c0_44 = arith.constant 0 : index
    %c0_45 = arith.constant 0 : index
    %140 = vector.load %arg11[%c0_44, %c0_45] : memref<32x32xf32, #tpu.memory_space<vmem>>, vector<32x32xf32>
    tpu.vector_store %arg11[%c0_44, %c0_45], %139 {strides = array<i32>} : memref<32x32xf32, #tpu.memory_space<vmem>>, vector<32x32xf32>,
    %c1_i32 = arith.constant 1 : i32
    %141 = arith.cmpi eq, %arg0, %c1_i32 : i32
    %142 = arith.extui %141 : i1 to i32
    %c0_i32_46 = arith.constant 0 : i32
    %143 = arith.cmpi ne, %142, %c0_i32_46 : i32
    scf.if %143 {
      %c0_47 = arith.constant 0 : index
      %c0_48 = arith.constant 0 : index
      %144 = vector.load %arg8[%c0_47, %c0_48] : memref<8x128xf32, #tpu.memory_space<vmem>>, vector<8x128xf32>
      %145 = vector.extract_strided_slice %144 {offsets = [0, 0], sizes = [1, 32], strides = [1, 1]} : vector<8x128xf32> to vector<1x32xf32>
      %146 = vector.extract_strided_slice %144 {offsets = [1, 0], sizes = [1, 32], strides = [1, 1]} : vector<8x128xf32> to vector<1x32xf32>
      %cst_49 = arith.constant dense<0.000000e+00> : vector<32xf32>
      %147 = vector.multi_reduction <add>, %139, %cst_49 [1] : vector<32x32xf32> to vector<32xf32>
      %148 = vector.shape_cast %147 : vector<32xf32> to vector<32x1xf32>
      %cst_50 = arith.constant 3.200000e+01 : f32
      %149 = vector.broadcast %cst_50 : f32 to vector<32x1xf32>
      %150 = arith.divf %148, %149 : vector<32x1xf32>
      %151 = vector.broadcast %150 : vector<32x1xf32> to vector<32x32xf32>
      %152 = arith.subf %139, %151 : vector<32x32xf32>
      %153 = arith.mulf %152, %152 : vector<32x32xf32>
      %cst_51 = arith.constant dense<0.000000e+00> : vector<32xf32>
      %154 = vector.multi_reduction <add>, %153, %cst_51 [1] : vector<32x32xf32> to vector<32xf32>
      %155 = vector.shape_cast %154 : vector<32xf32> to vector<32x1xf32>
      %cst_52 = arith.constant 3.200000e+01 : f32
      %156 = vector.broadcast %cst_52 : f32 to vector<32x1xf32>
      %157 = arith.divf %155, %156 : vector<32x1xf32>
      %158 = vector.broadcast %150 : vector<32x1xf32> to vector<32x32xf32>
      %159 = arith.subf %139, %158 : vector<32x32xf32>
      %cst_53 = arith.constant 9.99999997E-7 : f32
      %160 = vector.broadcast %cst_53 : f32 to vector<32x1xf32>
      %161 = arith.addf %157, %160 : vector<32x1xf32>
      %162 = math.rsqrt %161 : vector<32x1xf32>
      %163 = vector.broadcast %162 : vector<32x1xf32> to vector<32x32xf32>
      %164 = arith.mulf %159, %163 : vector<32x32xf32>
      %165 = vector.broadcast %145 : vector<1x32xf32> to vector<32x32xf32>
      %166 = arith.mulf %164, %165 : vector<32x32xf32>
      %167 = vector.broadcast %146 : vector<1x32xf32> to vector<32x32xf32>
      %168 = arith.addf %166, %167 : vector<32x32xf32>
      %169 = arith.truncf %168 : vector<32x32xf32> to vector<32x32xbf16>
      %c0_54 = arith.constant 0 : index
      %c0_55 = arith.constant 0 : index
      %170 = vector.load %arg9[%c0_54, %c0_55] : memref<32x128xbf16, #tpu.memory_space<vmem>>, vector<32x128xbf16>
      %cst_56 = arith.constant dense<0.000000e+00> : vector<32x128xf32>
      %171 = tpu.matmul %169, %170, %cst_56 {dimension_numbers = #tpu.dot_dimension_numbers<[1], [0], [0], [1], [0, 0, 1, 1], [], []>} : vector<32x32xbf16>, vector<32x128xbf16>, vector<32x128xf32> -> vector<32x128xf32>
      %172 = vector.extract_strided_slice %144 {offsets = [2, 0], sizes = [1, 128], strides = [1, 1]} : vector<8x128xf32> to vector<1x128xf32>
      %173 = vector.broadcast %172 : vector<1x128xf32> to vector<32x128xf32>
      %174 = arith.addf %171, %173 : vector<32x128xf32>
      %c0_57 = arith.constant 0 : index
      %c0_58 = arith.constant 0 : index
      %175 = vector.load %arg10[%c0_57, %c0_58] : memref<32x128xf32, #tpu.memory_space<vmem>>, vector<32x128xf32>
      tpu.vector_store %arg10[%c0_57, %c0_58], %174 {strides = array<i32>} : memref<32x128xf32, #tpu.memory_space<vmem>>, vector<32x128xf32>,
    } else {
    }
    return
  }
  func.func @transform_0(%arg0: i32) -> (i32, i32) {
    %c0_i32 = arith.constant 0 : i32
    %c0_i32_0 = arith.constant 0 : i32
    %c0_i32_1 = arith.constant 0 : i32
    return %c0_i32, %c0_i32_0 : i32, i32
  }
  func.func @transform_1(%arg0: i32) -> (i32, i32) {
    %c0_i32 = arith.constant 0 : i32
    %c0_i32_0 = arith.constant 0 : i32
    %c0_i32_1 = arith.constant 0 : i32
    return %c0_i32, %c0_i32_0 : i32, i32
  }
  func.func @transform_2(%arg0: i32) -> (i32, i32, i32) {
    %c0_i32 = arith.constant 0 : i32
    %c0_i32_0 = arith.constant 0 : i32
    %c0_i32_1 = arith.constant 0 : i32
    return %arg0, %c0_i32, %c0_i32_0 : i32, i32, i32
  }
  func.func @transform_3(%arg0: i32) -> (i32, i32, i32) {
    %c0_i32 = arith.constant 0 : i32
    %c0_i32_0 = arith.constant 0 : i32
    %c0_i32_1 = arith.constant 0 : i32
    return %arg0, %c0_i32, %c0_i32_0 : i32, i32, i32
  }
  func.func @transform_4(%arg0: i32) -> (i32, i32, i32) {
    %c0_i32 = arith.constant 0 : i32
    %c0_i32_0 = arith.constant 0 : i32
    %c0_i32_1 = arith.constant 0 : i32
    return %arg0, %c0_i32, %c0_i32_0 : i32, i32, i32
  }
  func.func @transform_5(%arg0: i32) -> (i32, i32, i32) {
    %c0_i32 = arith.constant 0 : i32
    %c0_i32_0 = arith.constant 0 : i32
    %c0_i32_1 = arith.constant 0 : i32
    return %arg0, %c0_i32, %c0_i32_0 : i32, i32, i32
  }
  func.func @transform_6(%arg0: i32) -> (i32, i32, i32) {
    %c0_i32 = arith.constant 0 : i32
    %c0_i32_0 = arith.constant 0 : i32
    %c0_i32_1 = arith.constant 0 : i32
    return %arg0, %c0_i32, %c0_i32_0 : i32, i32, i32
  }
  func.func @transform_7(%arg0: i32) -> (i32, i32) {
    %c0_i32 = arith.constant 0 : i32
    %c0_i32_0 = arith.constant 0 : i32
    %c0_i32_1 = arith.constant 0 : i32
    return %c0_i32, %c0_i32_0 : i32, i32
  }
  func.func @transform_8(%arg0: i32) -> (i32, i32) {
    %c0_i32 = arith.constant 0 : i32
    %c0_i32_0 = arith.constant 0 : i32
    %c0_i32_1 = arith.constant 0 : i32
    return %c0_i32, %c0_i32_0 : i32, i32
  }
  func.func @transform_9(%arg0: i32) -> (i32, i32) {
    %c0_i32 = arith.constant 0 : i32
    %c0_i32_0 = arith.constant 0 : i32
    %c0_i32_1 = arith.constant 0 : i32
    return %c0_i32, %c0_i32_0 : i32, i32
  }
}

</mosaic_0001>

<bundles_post_ra>
// kernel: tpu_custom_call.1
= control target key start
LH: loop header
LB: loop body
LE: loop exit
PB: predicated region body
PF: predicated region fallthrough
CT: control target
= control target key end

     0   :  { %s2661_s0 = inlined_call_operand.vmem [shape: f32[32,32], index: 0, kind: input, shape index: {}]   ;;  %s2662_s1 = inlined_call_operand.vmem [shape: f32[32,32], index: 1, kind: input, shape index: {}]   ;;  %s2663_s2 = inlined_call_operand.hbm [shape: f32[2,8,128], index: 2, kind: input, shape index: {}]   ;;  %s2664_s3 = inlined_call_operand.vmem [shape: bf16[2,32,96], index: 3, kind: input, shape index: {}]   ;;  %s2665_s4 = inlined_call_operand.hbm [shape: bf16[2,32,32], index: 4, kind: input, shape index: {}]   ;;  %s2666_s5 = inlined_call_operand.hbm [shape: bf16[2,32,64], index: 5, kind: input, shape index: {}]   ;;  %s2667_s6 = inlined_call_operand.vmem [shape: bf16[2,64,32], index: 6, kind: input, shape index: {}]   ;;  %s2668_s7 = inlined_call_operand.vmem [shape: f32[8,128], index: 7, kind: input, shape index: {}]   ;;  %s2669_s8 = inlined_call_operand.vmem [shape: bf16[32,128], index: 8, kind: input, shape index: {}]   ;;  %s2670_s9 = inlined_call_operand.hbm [shape: f32[32,128], index: 9, kind: output, shape index: {}]  }
   0x1   :  { %2680 = sst [smem:[#allocation16_spill]] %s2665_s4 }
   0x2   :  { %14 = vsyncpa [#allocation4], 0 }
   0x3   :  { %16 = vsyncpa [#allocation4 + $0x1], 0 }
   0x4   :  { %17 = vsyncpa [#allocation7], 0 }
   0x5   :  { %19 = vsyncpa [#allocation7 + $0x1], 0 }
   0x6   :  { %20 = vsyncpa [#allocation5], 0  ;;  %s2194_s30 = smov 0   ;;  %s2196_s10 = smov 0  }
   0x7   :  { %s2198_s11 = smov 0   ;;  %s2200_s12 = smov 0  }
   0x8 LB: > { %2681 = sst [smem:[#allocation13_spill]] %s2124_s11  ;;  %s2213_s13 = sadd.s32 4294967295, %s2128_s12   ;;  %s2128_s12 = sphi %s2200_s12, %s2695_s12   ;;  %s2124_s11 = sphi %s2198_s11, %s2697_s11   ;;  %s2120_s10 = sphi %s2196_s10, %s2699_s10   ;;  %s2116_s30 = sphi %s2194_s30, %s2698_s30  }
   0x9   : > { %s2216_s14 = sadd.s32 1, %s2128_s12   ;;  %s75_s16 = sadd.s32 1, %s2124_s11 }
   0xa   : > { %2682 = sst [smem:[#allocation14_spill]] %s2216_s14  ;;  %s72_s15 = ssub.s32 %s2128_s12, %s2216_s14 }
   0xb   : > { %p73_p0 = scmp.eq.s32.totalorder %s72_s15, 0  ;;  %p82_p1 = scmp.ne.s32.totalorder %s2124_s11, %s2120_s10 }
   0xc   : > { %p83_p2 = scmp.eq.s32.totalorder %s2128_s12, 0  ;;  %p88_p3 = scmp.ne.s32.totalorder %s2120_s10, %s2116_s30 }
   0xd   : > { %s2226_s17 = scalar_select %p73_p0, %s2124_s11, %s75_s16  }
   0xe   : > { %p84_p4 = por %p83_p2, %p82_p1  ;;  %p89_p5 = scmp.eq.s32.totalorder %s2213_s13, 0 }
   0xf   : > { %2683 = sst [smem:[#allocation15_spill]] %s2226_s17  ;;  %p1838_p6 = scmp.lt.s32.totalorder %s2128_s12, 2 }
  0x10   : > { %p2230_p7 = por %p89_p5, %p88_p3  ;;  %s2235_s19 = sand.u32 1, %s2124_s11  }
  0x11   : > { %p2237_p8 = pnand %p1838_p6, %p84_p4  ;;  %s317_s21 = sand.u32 1, %s2128_s12  }
  0x12   : > { %s2684_s18 = scalar_select %p2230_p7, 1, 0 }
  0x13   : > { %s2685_s20 = scalar_select %p2237_p8, 1, 0 }
  0x14   : > { %s2671_s22 = sshll.u32 %s2235_s19, 4  ;;  %s1696_s23 = sshll.u32 %s2128_s12, 8 }
  0x15   : > { %s321_s24 = scalar_lea.vmem [#allocation6], %s2671_s22  ;;  %s2686_s4 = sld [smem:[#allocation16_spill]] }
  0x16   : > { %s328_s25 = sshll.u32 %s321_s24, 4  ;;  %s2255_s29 = scalar_lea.sflag [#allocation7], %s317_s21  ;;  %s2253_s25 = int_to_ptr.vmem [resolvable:$true] %s328_s25 }
  0x17   : > { %p2261_p10 = pneg %p2237_p8 }
  0x1b   : > { %s2251_s28 = scalar_lea.hbm %s2686_s4, %s1696_s23  ;;  %s1975_s26 = scalar_lea.hbm %s2686_s4, 512 }
  0x1c   : > { %s1970_s30 = scalar_lea.hbm %s2251_s28, 256  ;;  %p1976_p13 = scmp.lt.u32.totalorder %s2251_s28, %s2686_s4 }
  0x1d   : > { %p1971_p9 = scmp.ne.s32.totalorder %s2251_s28, %s1970_s30  ;;  %p1977_p0 = scmp.lt.u32.totalorder %s1975_s26, %s1970_s30 }
  0x1e   : > { %p1979_p2 = scmp.lt.u32.totalorder %s1970_s30, %s2251_s28 }
  0x1f   : > { %p1973_p11 = pnand %p2261_p10, %p1971_p9  ;;  %p1978_p1 = por %p1977_p0, %p1976_p13 }
  0x21   : > { %p1974_p12 = pneg %p1973_p11  ;;  %p1980_p3 = por %p1979_p2, %p1978_p1 }
  0x23   : > { %p1981_p4 = pnand %p1980_p3, %p1974_p12 }
  0x25   : > { %1984 = shalt.err (!%p1981_p4)
}
  0x26   : > { %s1985_s21 = scalar_lea.vmem %s2253_s25, 256  ;;  %s2130_s16 = smov [#allocation6]  }
  0x27   : > { %p1986_p5 = scmp.ne.s32.totalorder %s2253_s25, %s1985_s21  ;;  %s1990_s24 = sshll.u32 %s2130_s16, 4  ;;  %s1991_s24 = int_to_ptr.vmem [resolvable:$false] %s1990_s24 }
  0x28   : > { %s1992_s22 = scalar_lea.vmem %s1991_s24, 512  ;;  %p1993_p11 = scmp.lt.s32.totalorder %s2253_s25, %s1991_s24 }
  0x29   : > { %p1988_p6 = pnand %p1986_p5, %p2261_p10  ;;  %p1994_p7 = scmp.lt.s32.totalorder %s1992_s22, %s1985_s21 }
  0x2b   : > { %p1989_p9 = pneg %p1988_p6  ;;  %p1995_p13 = por %p1994_p7, %p1993_p11 }
  0x2d   : > { %p1996_p0 = pnand %p1995_p13, %p1989_p9 }
  0x2f   : > { %1999 = shalt.err (!%p1996_p0)
}
  0x30   : > { %s2674_s30 = smov 64   ;;  %s2675_s26 = smov 4  }
  0x31   : > { %1834 = dma.hbm_to_vmem [thread:$0]  (!%p2237_p8), %s2251_s28, 256, %s2253_s25, %s2255_s29, %s2674_s30, %s2674_s30, %s2675_s26  }
  0x32   : > { %s2293_s16 = scalar_lea.hbm %s2666_s5, %s1696_s23  ;;  %s2688_s24 = sshll.u32 %s2235_s19, 4 }
  0x33   : > { %s342_s22 = scalar_lea.vmem [#allocation8], %s2688_s24  ;;  %p1652_p7 = scmp.ge.s32.totalorder %s2128_s12, 1 }
  0x34   : > { %s349_s4 = sshll.u32 %s342_s22, 4  ;;  %p365_p12 = scmp.lt.s32.totalorder %s2128_s12, 3  ;;  %s2298_s4 = int_to_ptr.vmem [resolvable:$true] %s349_s4 }
  0x35   : > { %s1644_s17 = sshll.u32 %s2235_s19, 3  ;;  %s1645_s25 = sshll.u32 %s2128_s12, 7 }
  0x36   : > { %p2302_p1 = pnand %p1652_p7, %p365_p12  ;;  %s295_s28 = scalar_lea.vmem [#allocation3], %s1644_s17 }
  0x37   : > { %s302_s30 = sshll.u32 %s295_s28, 4  ;;  %s2310_s23 = scalar_lea.hbm %s2663_s2, %s1645_s25  ;;  %s303_s30 = int_to_ptr.vmem [resolvable:$true] %s302_s30 }
  0x38   : > { %s2689_s11 = scalar_select %p2302_p1, 1, 0 }
  0x39   : > { %s292_s21 = scalar_lea.sflag [#allocation4], %s2235_s19  ;;  %s2000_s24 = scalar_lea.hbm %s2310_s23, 128 }
  0x3a   : > { %p2001_p2 = scmp.ne.s32.totalorder %s2310_s23, %s2000_s24  ;;  %s2005_s17 = scalar_lea.hbm %s2663_s2, 256 }
  0x3b   : > { %p2006_p5 = scmp.lt.u32.totalorder %s2310_s23, %s2663_s2  ;;  %p2007_p6 = scmp.lt.u32.totalorder %s2005_s17, %s2000_s24 }
  0x3c   : > { %p2003_p3 = pnand %p2001_p2, %p2261_p10  ;;  %p2009_p11 = scmp.lt.u32.totalorder %s2000_s24, %s2310_s23 }
  0x3d   : > { %p2008_p9 = por %p2007_p6, %p2006_p5 }
  0x3e   : > { %p2004_p4 = pneg %p2003_p3 }
  0x3f   : > { %p2010_p13 = por %p2009_p11, %p2008_p9 }
  0x41   : > { %p2011_p0 = pnand %p2010_p13, %p2004_p4 }
  0x43   : > { %2014 = shalt.err (!%p2011_p0)
}
  0x44   : > { %s2015_s19 = scalar_lea.vmem %s303_s30, 128  ;;  %s2133_s26 = smov [#allocation3]  }
  0x45   : > { %p2016_p7 = scmp.ne.s32.totalorder %s303_s30, %s2015_s19  ;;  %s2020_s25 = sshll.u32 %s2133_s26, 4  ;;  %s2021_s25 = int_to_ptr.vmem [resolvable:$false] %s2020_s25 }
  0x46   : > { %s2022_s27 = scalar_lea.vmem %s2021_s25, 256  ;;  %p2023_p3 = scmp.lt.s32.totalorder %s303_s30, %s2021_s25 }
  0x47   : > { %p2018_p12 = pnand %p2016_p7, %p2261_p10  ;;  %p2024_p1 = scmp.lt.s32.totalorder %s2022_s27, %s2015_s19 }
  0x49   : > { %p2019_p2 = pneg %p2018_p12  ;;  %p2025_p8 = por %p2024_p1, %p2023_p3 }
  0x4b   : > { %p2026_p5 = pnand %p2025_p8, %p2019_p2 }
  0x4d   : > { %2029 = shalt.err (!%p2026_p5)
}
  0x4e   : > { %p2690_p6 = scmp.ne.s32.totalorder %s2685_s20, 0  ;;  %s2030_s14 = scalar_lea.hbm %s2293_s16, 256 }
  0x4f   : > { %p2031_p4 = scmp.ne.s32.totalorder %s2293_s16, %s2030_s14  ;;  %s2035_s12 = scalar_lea.hbm %s2666_s5, 512 }
  0x50   : > { %1831 = dma.hbm_to_vmem [thread:$0]  (!%p2690_p6), %s2310_s23, 128, %s303_s30, %s292_s21  }
  0x51   : > { %p2033_p9 = pnand %p2031_p4, %p2261_p10  ;;  %p2036_p8 = scmp.lt.u32.totalorder %s2293_s16, %s2666_s5 }
  0x52   : > { %p2037_p1 = scmp.lt.u32.totalorder %s2035_s12, %s2030_s14  ;;  %p2039_p0 = scmp.lt.u32.totalorder %s2030_s14, %s2293_s16 }
  0x53   : > { %p2034_p11 = pneg %p2033_p9 }
  0x54   : > { %p2038_p13 = por %p2037_p1, %p2036_p8 }
  0x56   : > { %p2040_p7 = por %p2039_p0, %p2038_p13 }
  0x58   : > { %p2041_p12 = pnand %p2040_p7, %p2034_p11 }
  0x5a   : > { %2044 = shalt.err (!%p2041_p12)
}
  0x5b   : > { %s2045_s30 = scalar_lea.vmem %s2298_s4, 256  ;;  %s2134_s23 = smov [#allocation8]  }
  0x5c   : > { %p2046_p2 = scmp.ne.s32.totalorder %s2298_s4, %s2045_s30  ;;  %s2050_s21 = sshll.u32 %s2134_s23, 4  ;;  %s2051_s21 = int_to_ptr.vmem [resolvable:$false] %s2050_s21 }
  0x5d   : > { %s2052_s19 = scalar_lea.vmem %s2051_s21, 512  ;;  %p2053_p4 = scmp.lt.s32.totalorder %s2298_s4, %s2051_s21 }
  0x5e   : > { %p2048_p3 = pnand %p2046_p2, %p2261_p10  ;;  %p2054_p9 = scmp.lt.s32.totalorder %s2052_s19, %s2045_s30 }
  0x60   : > { %p2049_p5 = pneg %p2048_p3  ;;  %p2055_p8 = por %p2054_p9, %p2053_p4 }
  0x62   : > { %p2056_p1 = pnand %p2055_p8, %p2049_p5 }
  0x64   : > { %2059 = shalt.err (!%p2056_p1)
}
  0x65   : > { %s2691_s26 = smov 4   ;;  %s2692_s25 = smov 64  }
  0x66   : > { %1837 = dma.hbm_to_vmem [thread:$0]  (!%p2690_p6), %s2293_s16, 256, %s2298_s4, %s2255_s29, %s2692_s25, %s2692_s25, %s2691_s26  }
  0x67   : > { %p2693_p10 = scmp.ne.s32.totalorder %s2689_s11, 0 }
  0x68   : > { %s371_s15 = sand.u32 (!%p2693_p10), 1, %s2120_s10   ;;  %p2694_p11 = scmp.ne.s32.totalorder (!%p2693_p10), %s2684_s18, 0 }
  0x69   : > { %369 = sbr.rel (%p2693_p10) target bundleno = 3806 (0xede), region = 56  ;;  %s1653_s27 = sshll.u32 (!%p2693_p10), %s371_s15, 3 }
  0x6a   : > { %s372_s14 = scalar_lea.sflag (!%p2693_p10), [#allocation4], %s371_s15  ;;  %s2358_s24 = scalar_lea.vmem (!%p2693_p10), [#allocation3], %s1653_s27 }
  0x70   : > { %2103 = dma.done.wait (%p2694_p11), %s372_s14, 128  }
  0x71   : > { %2105 = vsyncadd (%p2694_p11), %s372_s14, 4294967168  ;;  %s380_s20 = sand.u32 1, %s2213_s13   ;;  %s1654_s22 = sshll.u32 %s371_s15, 4 }
  0x72   : > { %s381_s4 = scalar_lea.sflag [#allocation7], %s380_s20  ;;  %s2365_s29 = scalar_lea.vmem [#allocation6], %s1654_s22 }
  0x73   : > { %2107 = dma.done.wait (%p2694_p11), %s381_s4, 512  }
  0x74   : > { %2109 = vsyncadd (%p2694_p11), %s381_s4, 4294966784  ;;  %p443_p6 = scmp.lt.s32.totalorder %s2213_s13, 1  ;;  %s2383_s26 = scalar_lea.vmem [#allocation8], %s1654_s22 }
  0x75   : > { %p1660_p13 = scmp.ne.s32.totalorder %s2213_s13, 0 }
  0x76   : > { %s444_s11 = scalar_select %p443_p6, %s2213_s13, 1 }
  0x77   : > { %457 = sbr.rel (%p1660_p13) target bundleno = 126 (0x7e), region = 72  ;;  %v458_v0 = vld [vmem:[%s2661_s0] sm:$0xff] (!%p1660_p13)  ;;  %vm462_vm0 = vcmask (!%p1660_p13), 261120   ;;  %v459_v1 = vld [vmem:[%s2661_s0 + $0x8] sm:$0xff] (!%p1660_p13)  ;;  %v460_v2 = vld [vmem:[%s2661_s0 + $0x10] sm:$0xff] (!%p1660_p13) }
  0x78   : > { %s1698_s16 = sshll.u32 %s444_s11, 4  ;;  %s1699_s12 = sshll.u32 %s444_s11, 5  ;;  %463 = vst.msk [vmem:[#allocation2] sm:$0xff] (!%p1660_p13), %vm462_vm0, %v458_v0  ;;  %464 = vst.msk [vmem:[#allocation2 + $0x8] sm:$0xff] (!%p1660_p13), %vm462_vm0, %v459_v1  ;;  %v461_v3 = vld [vmem:[%s2661_s0 + $0x18] sm:$0xff] (!%p1660_p13) }
  0x79   : > { %s2376_s30 = scalar_lea.vmem %s2664_s3, %s1698_s16  ;;  %s2381_s19 = scalar_lea.vmem %s2667_s6, %s1699_s12  ;;  %465 = vst.msk [vmem:[#allocation2 + $0x10] sm:$0xff] (!%p1660_p13), %vm462_vm0, %v460_v2  ;;  %466 = vst.msk [vmem:[#allocation2 + $0x18] sm:$0xff] (!%p1660_p13), %vm462_vm0, %v461_v3 }
  0x7e PF: > { %vm476_vm1 = vcmask 261120   ;;  %v1894_v32 = vld [vmem:[%s2376_s30] sm:$0xff]   ;;  %v1895_v33 = vld [vmem:[%s2376_s30 + $0x8] sm:$0xff]   ;;  %v530_v39 = vlaneseq  ;;  %vm637_vm2 = vcmask 130048   ;;  %s2136_s18 = smov 64   ;;  %s2137_s25 = smov 80  }
  0x7f   : > { %v2398_v4 = vld [vmem:[#allocation2] sm:$0xff]  ;;  %v2402_v6 = vld [vmem:[#allocation2 + $0x8] sm:$0xff]  ;;  %1738 = vmatprep.subr.bf16.mxu0 %v1894_v32  ;;  %s2138_s15 = smov 112   ;;  %s2139_s27 = smov 48   ;;  %vm1289_vm3 = vcmask 523264  }
  0x80   : > { %v2400_v5 = vld [vmem:[#allocation2 + $0x10] sm:$0xff]  ;;  %v477_v7 = vsel %vm476_vm1, %v2398_v4, 0.0  ;;  %v2408_v9 = vld [vmem:[#allocation2 + $0x18] sm:$0xff]  ;;  %v480_v10 = vsel %vm476_vm1, %v2402_v6, 0.0  ;;  %1739 = vmatpush3.bf16.msra.mxu0 %v1894_v32  ;;  %v2424_v45 = vshrl.u32 %v530_v39, 7  ;;  %v2428_v49 = vld [vmem:[%s2358_s24] sm:$0xff] }
  0x81   : > { %v483_v8 = vsel %vm476_vm1, %v2400_v5, 0.0  ;;  %478 = vadd.xlane.f32.xlu0 %v477_v7  ;;  %v486_v11 = vsel %vm476_vm1, %v2408_v9, 0.0  ;;  %1740 = vmatprep.subr.bf16.mxu0 %v1895_v33  ;;  %s2135_s24 = smov 96   ;;  %s2140_s14 = smov 16  }
  0x82   : > { %484 = vadd.xlane.f32.xlu1 %v483_v8  ;;  %v532_v48 = vsub.s32 0, %v2424_v45  ;;  %v540_v53 = vsub.s32 1, %v2424_v45  ;;  %p1687_p0 = scmp.ne.s32.totalorder %s2213_s13, 1 }
  0x84   : > { %1741 = vmatpush3.bf16.msra.mxu0 %v1895_v33  ;;  %v533_v52 = vrot.slane %v2428_v49, %v532_v48  ;;  %v541_v58 = vrot.slane %v2428_v49, %v540_v53  ;;  %v2464_v33 = vld [vmem:[%s2662_s1] sm:$0xff] }
  0x85   : > { %481 = vadd.xlane.f32.xlu0 %v480_v10 }
  0x86   : > { %487 = vadd.xlane.f32.xlu1 %v486_v11  ;;  %v554_v11 = vsub.s32 2, %v2424_v45 }
 0x10e   : > { %v479_v12 = vpop.xlane.xlu0 %478 }
 0x10f   : > { %v485_v13 = vpop.xlane.xlu1 %484  ;;  %v490_v14 = vmul.f32 0.03125, %v479_v12  ;;  %v555_v12 = vrot.slane %v2428_v49, %v554_v11 }
 0x110   : > { %v492_v15 = vmul.f32 0.03125, %v485_v13 }
 0x111   : > { %v494_v16 = vsub.f32 %v2398_v4, %v490_v14 }
 0x112   : > { %v496_v17 = vsub.f32 %v2400_v5, %v492_v15  ;;  %v482_v18 = vpop.xlane.xlu0 %481 }
 0x113   : > { %v488_v19 = vpop.xlane.xlu1 %487  ;;  %v491_v20 = vmul.f32 0.03125, %v482_v18  ;;  %v498_v22 = vmul.f32 %v494_v16, %v494_v16 }
 0x114   : > { %v493_v21 = vmul.f32 0.03125, %v488_v19  ;;  %v500_v23 = vmul.f32 %v496_v17, %v496_v17 }
 0x115   : > { %v495_v24 = vsub.f32 %v2402_v6, %v491_v20  ;;  %v502_v26 = vsel %vm476_vm1, %v498_v22, 0.0 }
 0x116   : > { %v497_v25 = vsub.f32 %v2408_v9, %v493_v21  ;;  %503 = vadd.xlane.f32.xlu0 %v502_v26  ;;  %v508_v27 = vsel %vm476_vm1, %v500_v23, 0.0 }
 0x117   : > { %v499_v28 = vmul.f32 %v495_v24, %v495_v24 }
 0x118   : > { %v501_v29 = vmul.f32 %v497_v25, %v497_v25 }
 0x119   : > { %v505_v30 = vsel %vm476_vm1, %v499_v28, 0.0 }
 0x11a   : > { %509 = vadd.xlane.f32.xlu0 %v508_v27  ;;  %506 = vadd.xlane.f32.xlu1 %v505_v30  ;;  %v511_v31 = vsel %vm476_vm1, %v501_v29, 0.0 }
 0x11e   : > { %512 = vadd.xlane.f32.xlu1 %v511_v31 }
 0x1a3   : > { %v504_v34 = vpop.xlane.xlu0 %503 }
 0x1a4   : > { %v514_v35 = vmul.f32 0.03125, %v504_v34 }
 0x1a6   : > { %v518_v36 = vadd.f32 1e-06, %v514_v35 }
 0x1a7   : > { %v507_v37 = vpop.xlane.xlu1 %506  ;;  %v510_v38 = vpop.xlane.xlu0 %509 }
 0x1a8   : > { %1904 = vrsqrt.f32 %v518_v36  ;;  %v515_v40 = vmul.f32 0.03125, %v507_v37  ;;  %v516_v41 = vmul.f32 0.03125, %v510_v38  ;;  %v2469_v36 = vld [vmem:[%s2662_s1 + $0x18] sm:$0xff]  ;;  %v2474_v37 = vld [vmem:[%s2662_s1 + $0x8] sm:$0xff] }
 0x1aa   : > { %v519_v42 = vadd.f32 1e-06, %v515_v40  ;;  %v520_v43 = vadd.f32 1e-06, %v516_v41  ;;  %v2480_v40 = vld [vmem:[%s2662_s1 + $0x10] sm:$0xff] }
 0x1ab   : > { %v513_v44 = vpop.xlane.xlu1 %512 }
 0x1ac   : > { %1906 = vrsqrt.f32 %v519_v42  ;;  %v517_v46 = vmul.f32 0.03125, %v513_v44 }
 0x1ad   : > { %1908 = vrsqrt.f32 %v520_v43 }
 0x1ae   : > { %v521_v47 = vadd.f32 1e-06, %v517_v46 }
 0x1b0   : > { %1910 = vrsqrt.f32 %v521_v47 }
 0x1b2   : > { %v1905_v50 = vpop.eup %1904 }
 0x1b3   : > { %v526_v51 = vmul.f32 %v1905_v50, %v494_v16 }
 0x1b5   : > { %v534_v57 = vmul.f32 %v533_v52, %v526_v51 }
 0x1b6   : > { %v1907_v54 = vpop.eup %1906 }
 0x1b7   : > { %v1909_v55 = vpop.eup %1908  ;;  %v527_v56 = vmul.f32 %v1907_v54, %v495_v24  ;;  %v542_v63 = vadd.f32 %v541_v58, %v534_v57 }
 0x1b8   : > { %v528_v59 = vmul.f32 %v1909_v55, %v496_v17 }
 0x1b9   : > { %v535_v60 = vmul.f32 %v533_v52, %v527_v56 }
 0x1ba   : > { %v1911_v61 = vpop.eup %1910  ;;  %v536_v1 = vmul.f32 %v533_v52, %v528_v59 }
 0x1bb   : > { %v529_v62 = vmul.f32 %v1911_v61, %v497_v25  ;;  %v543_v0 = vadd.f32 %v541_v58, %v535_v60 }
 0x1bc   : > { %v544_v7 = vadd.f32 %v541_v58, %v536_v1 }
 0x1bd   : > { %v546_v2 = vpack.c.bf16 %v543_v0, %v542_v63  ;;  %v537_v3 = vmul.f32 %v533_v52, %v529_v62 }
 0x1bf   : > { %1742 = vmatprep.mubr.msk.bf16.mxu0 %vm476_vm1, %v546_v2  ;;  %v545_v8 = vadd.f32 %v541_v58, %v537_v3 }
 0x1c1   : > { %v547_v10 = vpack.c.bf16 %v545_v8, %v544_v7 }
 0x1c3   : > { %1743 = vmatmul.mubr.msk.bf16.vlgmr.msra.gmra.mrb[0].mxu0 %vm476_vm1, %v547_v10 }
 0x296   : > { %v1744_v13 = vpop.f32.mrb[0].mxu0 }
 0x297   : > { %v617_v14 = vadd.f32 %v1744_v13, %v555_v12  ;;  %v608_v15 = vpop.f32.mrb[1].mxu0 }
 0x298   : > { %v609_v16 = vadd.f32 %v608_v15, %v555_v12  ;;  %v1745_v17 = vpop.f32.mrb[2].mxu0 }
 0x299   : > { %v620_v18 = vadd.f32 %v1745_v17, %v555_v12  ;;  %v611_v19 = vpop.f32.mrb[3].mxu0  ;;  %v625_v21 = vmul.f32 0.25, %v617_v14 }
 0x29a   : > { %v612_v20 = vadd.f32 %v611_v19, %v555_v12  ;;  %v623_v24 = vmul.f32 0.25, %v609_v16 }
 0x29b   : > { %v626_v22 = vmul.f32 0.25, %v620_v18  ;;  %v2443_v23 = vpack.c.bf16 %v620_v18, %v617_v14 }
 0x29c   : > { %v624_v25 = vmul.f32 0.25, %v612_v20  ;;  %v2445_v26 = vpack.c.bf16 %v612_v20, %v609_v16 }
 0x29d   : > { %v2447_v27 = vpack.c.bf16 %v626_v22, %v625_v21  ;;  %635 = vrot.lane.b32.xlu1 %v2443_v23, %s2135_s24 }
 0x29e   : > { %633 = vrot.lane.b32.xlu0 %v2445_v26, %s2135_s24  ;;  %v2451_v28 = vpack.c.bf16 %v624_v25, %v623_v24 }
 0x2a0   : > { %1750 = vmatprep.mubr.msk.bf16.mxu1 %vm637_vm2, %v2451_v28 }
 0x30f   : > { %v636_v31 = vpop.permute.xlu1 %635 }
 0x310   : > { %v634_v29 = vpop.permute.xlu0 %633  ;;  %v648_v32 = vsel %vm637_vm2, %v636_v31, 0 }
 0x311   : > { %1814 = vmatprep.subr.msk.bf16.mxu1 %vm637_vm2, %v634_v29  ;;  %v645_v30 = vsel %vm637_vm2, %v634_v29, 0 }
 0x312   : > { %1747 = vmatpush3.bf16.xpose.msra.mxu1 %v645_v30 }
 0x313   : > { %1815 = vmatprep.subr.msk.bf16.mxu1 %vm637_vm2, %v636_v31 }
 0x31a   : > { %1749 = vmatpush3.bf16.xpose.msra.mxu1 %v648_v32 }
 0x321   : > { %1751 = vmatmul.mubr.msk.bf16.vlgmr.msra.gmra.mrb[0].mxu1 %vm637_vm2, %v2447_v27 }
 0x3f4   : > { %v1752_v34 = vpop.f32.mrb[0].mxu1 }
 0x3f5   : > { %v684_v35 = vpop.f32.mrb[1].mxu1  ;;  %v693_v46 = vadd.f32 %v1752_v34, %v2480_v40 }
 0x3f6   : > { %v685_v38 = vadd.f32 %v684_v35, %v2464_v33  ;;  %v1753_v39 = vpop.f32.mrb[2].mxu1 }
 0x3f7   : > { %v687_v41 = vpop.f32.mrb[3].mxu1  ;;  %v696_v42 = vadd.f32 %v1753_v39, %v2469_v36  ;;  %v705_v51 = vsel %vm476_vm1, %v693_v46, -inf }
 0x3f8   : > { %v688_v43 = vadd.f32 %v687_v41, %v2474_v37  ;;  %v699_v44 = vsel %vm476_vm1, %v685_v38, -inf }
 0x3f9   : > { %700 = vmax.xlane.f32.xlu1 %v699_v44  ;;  %v708_v50 = vsel %vm476_vm1, %v696_v42, -inf }
 0x3fa   : > { %v702_v47 = vsel %vm476_vm1, %v688_v43, -inf }
 0x3fb   : > { %703 = vmax.xlane.f32.xlu0 %v702_v47 }
 0x3fd   : > { %709 = vmax.xlane.f32.xlu1 %v708_v50 }
 0x3ff   : > { %706 = vmax.xlane.f32.xlu0 %v705_v51 }
 0x40e   : > { %747 = vrot.lane.b32.xlu1 %v2443_v23, %s2136_s18 }
 0x486   : > { %v701_v52 = vpop.xlane.xlu1 %700 }
 0x487   : > { %v711_v57 = vsub.f32 %v685_v38, %v701_v52 }
 0x488   : > { %v704_v54 = vpop.xlane.xlu0 %703 }
 0x489   : > { %v712_v55 = vsub.f32 %v688_v43, %v704_v54  ;;  %v715_v63 = vmul.f32 1.442695, %v711_v57 }
 0x48a   : > { %v710_v56 = vpop.xlane.xlu1 %709 }
 0x48b   : > { %v714_v58 = vsub.f32 %v696_v42, %v710_v56  ;;  %v717_v59 = vmul.f32 1.442695, %v712_v55 }
 0x48c   : > { %v707_v60 = vpop.xlane.xlu0 %706 }
 0x48d   : > { %v721_v61 = vmul.f32 1.442695, %v714_v58  ;;  %v713_v62 = vsub.f32 %v693_v46, %v707_v60 }
 0x48e   : > { %v748_v14 = vpop.permute.xlu1 %747 }
 0x48f   : > { %1912 = vpow2.f32 %v721_v61  ;;  %v719_v0 = vmul.f32 1.442695, %v713_v62 }
 0x490   : > { %1914 = vpow2.f32 %v717_v59 }
 0x491   : > { %1916 = vpow2.f32 %v719_v0 }
 0x492   : > { %1918 = vpow2.f32 %v715_v63 }
 0x499   : > { %v1913_v1 = vpop.eup %1912 }
 0x49a   : > { %v1915_v2 = vpop.eup %1914  ;;  %v732_v3 = vsel %vm476_vm1, %v1913_v1, 0.0 }
 0x49b   : > { %v1917_v7 = vpop.eup %1916  ;;  %733 = vadd.xlane.f32.xlu1 %v732_v3  ;;  %v726_v12 = vsel %vm476_vm1, %v1915_v2, 0.0 }
 0x49c   : > { %v729_v8 = vsel %vm476_vm1, %v1917_v7, 0.0  ;;  %v1919_v10 = vpop.eup %1918 }
 0x49d   : > { %730 = vadd.xlane.f32.xlu0 %v729_v8  ;;  %v723_v13 = vsel %vm476_vm1, %v1919_v10, 0.0 }
 0x49f   : > { %727 = vadd.xlane.f32.xlu1 %v726_v12 }
 0x4a1   : > { %724 = vadd.xlane.f32.xlu0 %v723_v13 }
 0x4b0   : > { %812 = vrot.lane.b32.xlu1 %v2445_v26, %s2137_s25 }
 0x4b4   : > { %814 = vrot.lane.b32.xlu1 %v2443_v23, %s2137_s25 }
 0x4b7   : > { %745 = vrot.lane.b32.xlu0 %v2445_v26, %s2136_s18 }
 0x4b8   : > { %810 = vrot.lane.b32.xlu1 %v2447_v27, %s2138_s15 }
 0x4bb   : > { %808 = vrot.lane.b32.xlu0 %v2451_v28, %s2138_s15 }
 0x528   : > { %v734_v15 = vpop.xlane.xlu1 %733 }
 0x52a   : > { %v731_v16 = vpop.xlane.xlu0 %730 }
 0x52b   : > { %1920 = vrcp.f32 %v731_v16 }
 0x52c   : > { %v728_v17 = vpop.xlane.xlu1 %727 }
 0x52d   : > { %1922 = vrcp.f32 %v728_v17 }
 0x52e   : > { %1924 = vrcp.f32 %v734_v15  ;;  %v725_v18 = vpop.xlane.xlu0 %724 }
 0x52f   : > { %1926 = vrcp.f32 %v725_v18 }
 0x530   : > { %v813_v24 = vpop.permute.xlu1 %812 }
 0x531   : > { %v823_v35 = vsel %vm637_vm2, %v813_v24, 0 }
 0x532   : > { %v746_v19 = vpop.permute.xlu0 %745 }
 0x533   : > { %1754 = vmatprep.subr.bf16.mxu0 %v746_v19 }
 0x534   : > { %1755 = vmatpush3.bf16.msra.mxu0 %v746_v19  ;;  %v815_v38 = vpop.permute.xlu1 %814 }
 0x535   : > { %1756 = vmatprep.subr.bf16.mxu0 %v748_v14  ;;  %v1921_v20 = vpop.eup %1920  ;;  %v826_v39 = vsel %vm637_vm2, %v815_v38, 0 }
 0x536   : > { %v741_v27 = vmul.f32 %v1921_v20, %v1917_v7  ;;  %v809_v34 = vpop.permute.xlu0 %808 }
 0x537   : > { %v1923_v21 = vpop.eup %1922 }
 0x538   : > { %v1925_v22 = vpop.eup %1924  ;;  %1757 = vmatpush3.bf16.msra.mxu0 %v748_v14  ;;  %v740_v29 = vmul.f32 %v1923_v21, %v1915_v2  ;;  %v811_v41 = vpop.permute.xlu1 %810 }
 0x539   : > { %v1927_v25 = vpop.eup %1926  ;;  %1816 = vmatprep.subr.msk.bf16.mxu0 %vm637_vm2, %v813_v24  ;;  %v742_v30 = vmul.f32 %v1925_v22, %v1913_v1 }
 0x53a   : > { %v739_v28 = vmul.f32 %v1927_v25, %v1919_v10 }
 0x53b   : > { %v744_v32 = vpack.c.bf16 %v742_v30, %v741_v27 }
 0x53c   : > { %v743_v31 = vpack.c.bf16 %v740_v29, %v739_v28 }
 0x53e   : > { %1758 = vmatprep.mubr.msk.bf16.mxu0 %vm476_vm1, %v743_v31 }
 0x53f   : > { %1759 = vmatmul.mubr.msk.bf16.vlgmr.msra.gmra.mrb[4].mxu0 %vm476_vm1, %v744_v32 }
 0x540   : > { %1766 = vmatprep.mubr.msk.bf16.mxu0 %vm637_vm2, %v809_v34 }
 0x541   : > { %1763 = vmatpush3.bf16.xpose.msra.mxu0 %v823_v35 }
 0x542   : > { %1817 = vmatprep.subr.msk.bf16.mxu0 %vm637_vm2, %v815_v38  ;;  %v1896_v38 = vld [vmem:[%s2365_s29] sm:$0xff]  }
 0x549   : > { %1765 = vmatpush3.bf16.xpose.msra.mxu0 %v826_v39  ;;  %v1897_v39 = vld [vmem:[%s2365_s29 + $0x8] sm:$0xff]  }
 0x550   : > { %1767 = vmatmul.mubr.msk.bf16.vlgmr.msra.gmra.mrb[8].mxu0 %vm637_vm2, %v811_v41 }
 0x612   : > { %v2509_v42 = vpop.f32.mrb[4].mxu0 }
 0x613   : > { %v2511_v43 = vpop.f32.mrb[5].mxu0 }
 0x614   : > { %v2513_v44 = vpop.f32.mrb[6].mxu0 }
 0x615   : > { %v2515_v46 = vpop.f32.mrb[7].mxu0 }
 0x623   : > { %v1768_v47 = vpop.f32.mrb[8].mxu0 }
 0x624   : > { %v862_v50 = vpop.f32.mrb[9].mxu0  ;;  %v871_v55 = vadd.f32 %v1768_v47, %v2480_v40 }
 0x625   : > { %v863_v51 = vadd.f32 %v862_v50, %v2464_v33  ;;  %v1769_v52 = vpop.f32.mrb[10].mxu0 }
 0x626   : > { %v865_v54 = vpop.f32.mrb[11].mxu0  ;;  %v874_v59 = vadd.f32 %v1769_v52, %v2469_v36  ;;  %v883_v60 = vsel %vm476_vm1, %v871_v55, -inf }
 0x627   : > { %v866_v56 = vadd.f32 %v865_v54, %v2474_v37  ;;  %v877_v57 = vsel %vm476_vm1, %v863_v51, -inf }
 0x628   : > { %878 = vmax.xlane.f32.xlu0 %v877_v57  ;;  %v886_v61 = vsel %vm476_vm1, %v874_v59, -inf }
 0x629   : > { %v880_v58 = vsel %vm476_vm1, %v866_v56, -inf }
 0x62a   : > { %881 = vmax.xlane.f32.xlu1 %v880_v58 }
 0x62c   : > { %884 = vmax.xlane.f32.xlu0 %v883_v60 }
 0x630   : > { %887 = vmax.xlane.f32.xlu0 %v886_v61 }
 0x6b5   : > { %v879_v33 = vpop.xlane.xlu0 %878 }
 0x6b6   : > { %v889_v62 = vsub.f32 %v863_v51, %v879_v33 }
 0x6b7   : > { %v882_v63 = vpop.xlane.xlu1 %881 }
 0x6b8   : > { %v893_v37 = vmul.f32 1.442695, %v889_v62  ;;  %v890_v1 = vsub.f32 %v866_v56, %v882_v63 }
 0x6b9   : > { %v885_v40 = vpop.xlane.xlu0 %884 }
 0x6ba   : > { %v891_v0 = vsub.f32 %v871_v55, %v885_v40  ;;  %v895_v8 = vmul.f32 1.442695, %v890_v1 }
 0x6bc   : > { %v897_v2 = vmul.f32 1.442695, %v891_v0 }
 0x6bd   : > { %v888_v3 = vpop.xlane.xlu0 %887 }
 0x6be   : > { %1928 = vpow2.f32 %v897_v2  ;;  %v892_v7 = vsub.f32 %v874_v59, %v888_v3 }
 0x6bf   : > { %1930 = vpow2.f32 %v893_v37 }
 0x6c0   : > { %v899_v36 = vmul.f32 1.442695, %v892_v7 }
 0x6c2   : > { %1932 = vpow2.f32 %v899_v36 }
 0x6c3   : > { %1934 = vpow2.f32 %v895_v8 }
 0x6c8   : > { %v1929_v10 = vpop.eup %1928 }
 0x6c9   : > { %v907_v12 = vsel %vm476_vm1, %v1929_v10, 0.0  ;;  %v1931_v13 = vpop.eup %1930 }
 0x6ca   : > { %908 = vadd.xlane.f32.xlu0 %v907_v12  ;;  %v901_v15 = vsel %vm476_vm1, %v1931_v13, 0.0 }
 0x6cc   : > { %v1933_v14 = vpop.eup %1932 }
 0x6cd   : > { %v910_v16 = vsel %vm476_vm1, %v1933_v14, 0.0  ;;  %v1935_v17 = vpop.eup %1934 }
 0x6ce   : > { %902 = vadd.xlane.f32.xlu0 %v901_v15  ;;  %911 = vadd.xlane.f32.xlu1 %v910_v16  ;;  %v904_v18 = vsel %vm476_vm1, %v1935_v17, 0.0 }
 0x6d2   : > { %905 = vadd.xlane.f32.xlu1 %v904_v18 }
 0x6e3   : > { %925 = vrot.lane.b32.xlu1 %v2443_v23, %s2139_s27 }
 0x6e4   : > { %923 = vrot.lane.b32.xlu0 %v2445_v26, %s2139_s27 }
 0x757   : > { %v909_v19 = vpop.xlane.xlu0 %908 }
 0x75b   : > { %v912_v20 = vpop.xlane.xlu1 %911  ;;  %v903_v21 = vpop.xlane.xlu0 %902 }
 0x75c   : > { %1936 = vrcp.f32 %v912_v20 }
 0x75d   : > { %1938 = vrcp.f32 %v903_v21 }
 0x75e   : > { %1940 = vrcp.f32 %v909_v19 }
 0x75f   : > { %v906_v22 = vpop.xlane.xlu1 %905  ;;  %v924_v24 = vpop.permute.xlu0 %923 }
 0x760   : > { %1942 = vrcp.f32 %v906_v22  ;;  %1770 = vmatprep.subr.bf16.mxu1 %v924_v24 }
 0x761   : > { %1771 = vmatpush3.bf16.msra.mxu1 %v924_v24 }
 0x763   : > { %v926_v25 = vpop.permute.xlu1 %925 }
 0x764   : > { %1772 = vmatprep.subr.bf16.mxu1 %v926_v25 }
 0x765   : > { %1773 = vmatpush3.bf16.msra.mxu1 %v926_v25 }
 0x766   : > { %v1937_v27 = vpop.eup %1936  ;;  %1778 = vmatprep.subr.bf16.mxu1 %v1896_v38 }
 0x767   : > { %v1939_v23 = vpop.eup %1938  ;;  %v920_v29 = vmul.f32 %v1937_v27, %v1933_v14 }
 0x768   : > { %v1941_v28 = vpop.eup %1940  ;;  %v917_v30 = vmul.f32 %v1939_v23, %v1931_v13 }
 0x769   : > { %v919_v32 = vmul.f32 %v1941_v28, %v1929_v10 }
 0x76a   : > { %v1943_v26 = vpop.eup %1942 }
 0x76b   : > { %v918_v31 = vmul.f32 %v1943_v26, %v1935_v17  ;;  %v922_v35 = vpack.c.bf16 %v920_v29, %v919_v32 }
 0x76d   : > { %v921_v34 = vpack.c.bf16 %v918_v31, %v917_v30 }
 0x76f   : > { %1774 = vmatprep.mubr.msk.bf16.mxu1 %vm476_vm1, %v921_v34 }
 0x770   : > { %1775 = vmatmul.mubr.msk.bf16.vlgmr.msra.gmra.mrb[4].mxu1 %vm476_vm1, %v922_v35  ;;  %v1898_v35 = vld [vmem:[%s2383_s26] sm:$0xff]  }
 0x771   : > { %1779 = vmatpush3.bf16.msra.mxu1 %v1896_v38  ;;  %1786 = vmatprep.subr.bf16.mxu0 %v1898_v35  ;;  %v1899_v38 = vld [vmem:[%s2383_s26 + $0x8] sm:$0xff]  }
 0x772   : > { %1780 = vmatprep.subr.bf16.mxu1 %v1897_v39  ;;  %1787 = vmatpush3.bf16.msra.mxu0 %v1898_v35 }
 0x773   : > { %1788 = vmatprep.subr.bf16.mxu0 %v1899_v38 }
 0x775   : > { %1781 = vmatpush3.bf16.msra.mxu1 %v1897_v39 }
 0x776   : > { %1789 = vmatpush3.bf16.msra.mxu0 %v1899_v38 }
 0x843   : > { %v1776_v41 = vpop.f32.mrb[4].mxu1 }
 0x844   : > { %v969_v47 = vpop.f32.mrb[5].mxu1 }
 0x845   : > { %v1777_v50 = vpop.f32.mrb[6].mxu1 }
 0x846   : > { %v1889_v51 = vpack.i.bf16 %v1777_v50, %v1776_v41  ;;  %v972_v52 = vpop.f32.mrb[7].mxu1 }
 0x847   : > { %v1884_v54 = vpack.i.bf16 %v972_v52, %v969_v47 }
 0x849   : > { %1885 = vrot.lane.b32.xlu1 %v1884_v54, %s2140_s14 }
 0x84d   : > { %1890 = vrot.lane.b32.xlu1 %v1889_v51, %s2140_s14 }
 0x8bb   : > { %v1886_v55 = vpop.permute.xlu1 %1885 }
 0x8bc   : > { %v1888_v56 = vunpack.i.h.bf16 %v1886_v55  ;;  %v1887_v57 = vunpack.i.l.bf16 %v1886_v55 }
 0x8be   : > { %v1001_v58 = vsel %vm637_vm2, %v2515_v46, %v1888_v56  ;;  %v1000_v59 = vsel %vm637_vm2, %v2511_v43, %v1887_v57  ;;  %v1083_v46 = vsub.s32 3, %v2424_v45 }
 0x8bf   : > { %v1004_v60 = vpack.c.bf16 %v1001_v58, %v1000_v59  ;;  %v1891_v61 = vpop.permute.xlu1 %1890  ;;  %v1143_v59 = vsub.s32 4, %v2424_v45 }
 0x8c0   : > { %v1893_v33 = vunpack.i.h.bf16 %v1891_v61  ;;  %v1892_v62 = vunpack.i.l.bf16 %v1891_v61  ;;  %v1084_v43 = vrot.slane %v2428_v49, %v1083_v46 }
 0x8c1   : > { %1782 = vmatprep.mubr.msk.bf16.mxu1 %vm476_vm1, %v1004_v60  ;;  %v1144_v61 = vrot.slane %v2428_v49, %v1143_v59 }
 0x8c2   : > { %v1003_v63 = vsel %vm637_vm2, %v2513_v44, %v1893_v33  ;;  %v1002_v40 = vsel %vm637_vm2, %v2509_v42, %v1892_v62  ;;  %v1151_v33 = vsub.s32 5, %v2424_v45 }
 0x8c3   : > { %v1005_v0 = vpack.c.bf16 %v1003_v63, %v1002_v40 }
 0x8c5   : > { %1783 = vmatmul.mubr.msk.bf16.vlgmr.msra.gmra.mrb[8].mxu1 %vm476_vm1, %v1005_v0 }
 0x998   : > { %v1784_v37 = vpop.f32.mrb[8].mxu1 }
 0x999   : > { %v1062_v1 = vpop.f32.mrb[9].mxu1  ;;  %v1079_v2 = vadd.f32 %v1784_v37, %v2400_v5  ;;  %v1152_v37 = vrot.slane %v2428_v49, %v1151_v33 }
 0x99a   : > { %v1077_v3 = vadd.f32 %v1062_v1, %v2398_v4  ;;  %v1785_v7 = vpop.f32.mrb[10].mxu1 }
 0x99b   : > { %v1065_v8 = vpop.f32.mrb[11].mxu1  ;;  %v2552_v42 = vadd.f32 %v1084_v43, %v1079_v2  ;;  %v1080_v10 = vadd.f32 %v1785_v7, %v2408_v9 }
 0x99c   : > { %v2549_v36 = vadd.f32 %v1084_v43, %v1077_v3  ;;  %v1078_v44 = vadd.f32 %v1065_v8, %v2402_v6 }
 0x99d   : > { %v2561_v4 = vadd.f32 %v1084_v43, %v1080_v10  ;;  %v1095_v14 = vsel %vm476_vm1, %v2552_v42, 0.0 }
 0x99e   : > { %v2555_v12 = vadd.f32 %v1084_v43, %v1078_v44  ;;  %v1089_v13 = vsel %vm476_vm1, %v2549_v36, 0.0 }
 0x99f   : > { %1090 = vadd.xlane.f32.xlu0 %v1089_v13  ;;  %v1098_v6 = vsel %vm476_vm1, %v2561_v4, 0.0 }
 0x9a0   : > { %v1092_v5 = vsel %vm476_vm1, %v2555_v12, 0.0 }
 0x9a1   : > { %1093 = vadd.xlane.f32.xlu1 %v1092_v5 }
 0x9a3   : > { %1096 = vadd.xlane.f32.xlu0 %v1095_v14 }
 0x9a7   : > { %1099 = vadd.xlane.f32.xlu0 %v1098_v6 }
 0xa2c   : > { %v1091_v9 = vpop.xlane.xlu0 %1090 }
 0xa2d   : > { %v1101_v15 = vmul.f32 0.03125, %v1091_v9 }
 0xa2e   : > { %v1094_v16 = vpop.xlane.xlu1 %1093 }
 0xa2f   : > { %v1105_v17 = vsub.f32 %v2549_v36, %v1101_v15  ;;  %v1102_v18 = vmul.f32 0.03125, %v1094_v16  ;;  %v1900_v15 = vld [vmem:[%s2381_s19] sm:$0xff]   ;;  %v1901_v16 = vld [vmem:[%s2381_s19 + $0x8] sm:$0xff]  }
 0xa30   : > { %v1097_v19 = vpop.xlane.xlu0 %1096  ;;  %1794 = vmatprep.subr.bf16.mxu1 %v1900_v15 }
 0xa31   : > { %v1106_v20 = vsub.f32 %v2555_v12, %v1102_v18  ;;  %v1103_v21 = vmul.f32 0.03125, %v1097_v19  ;;  %v1109_v22 = vmul.f32 %v1105_v17, %v1105_v17  ;;  %1795 = vmatpush3.bf16.msra.mxu1 %v1900_v15  ;;  %v1903_v18 = vld [vmem:[%s2381_s19 + $0x18] sm:$0xff]   ;;  %v1165_v19 = vsub.s32 6, %v2424_v45 }
 0xa32   : > { %1796 = vmatprep.subr.bf16.mxu1 %v1901_v16 }
 0xa33   : > { %v1107_v24 = vsub.f32 %v2552_v42, %v1103_v21  ;;  %v1113_v25 = vsel %vm476_vm1, %v1109_v22, 0.0  ;;  %v1110_v27 = vmul.f32 %v1106_v20, %v1106_v20 }
 0xa34   : > { %1114 = vadd.xlane.f32.xlu0 %v1113_v25  ;;  %v1100_v23 = vpop.xlane.xlu0 %1099 }
 0xa35   : > { %v1104_v28 = vmul.f32 0.03125, %v1100_v23  ;;  %v1116_v26 = vsel %vm476_vm1, %v1110_v27, 0.0  ;;  %v1111_v29 = vmul.f32 %v1107_v24, %v1107_v24  ;;  %1797 = vmatpush3.bf16.msra.mxu1 %v1901_v16 }
 0xa36   : > { %1117 = vadd.xlane.f32.xlu1 %v1116_v26 }
 0xa37   : > { %v1108_v30 = vsub.f32 %v2561_v4, %v1104_v28  ;;  %v1119_v31 = vsel %vm476_vm1, %v1111_v29, 0.0 }
 0xa38   : > { %1120 = vadd.xlane.f32.xlu0 %v1119_v31 }
 0xa39   : > { %v1112_v32 = vmul.f32 %v1108_v30, %v1108_v30 }
 0xa3b   : > { %v1122_v34 = vsel %vm476_vm1, %v1112_v32, 0.0 }
 0xa3c   : > { %1123 = vadd.xlane.f32.xlu1 %v1122_v34 }
 0xac1   : > { %v1115_v39 = vpop.xlane.xlu0 %1114 }
 0xac2   : > { %v1125_v41 = vmul.f32 0.03125, %v1115_v39 }
 0xac3   : > { %v1118_v47 = vpop.xlane.xlu1 %1117 }
 0xac4   : > { %v1129_v50 = vadd.f32 1e-06, %v1125_v41  ;;  %v1126_v51 = vmul.f32 0.03125, %v1118_v47 }
 0xac5   : > { %v1121_v52 = vpop.xlane.xlu0 %1120 }
 0xac6   : > { %1944 = vrsqrt.f32 %v1129_v50  ;;  %v1130_v54 = vadd.f32 1e-06, %v1126_v51  ;;  %v1127_v55 = vmul.f32 0.03125, %v1121_v52 }
 0xac8   : > { %1946 = vrsqrt.f32 %v1130_v54  ;;  %v1131_v56 = vadd.f32 1e-06, %v1127_v55 }
 0xac9   : > { %v1124_v57 = vpop.xlane.xlu1 %1123 }
 0xaca   : > { %1948 = vrsqrt.f32 %v1131_v56  ;;  %v1128_v58 = vmul.f32 0.03125, %v1124_v57 }
 0xacc   : > { %v1132_v60 = vadd.f32 1e-06, %v1128_v58 }
 0xace   : > { %1950 = vrsqrt.f32 %v1132_v60 }
 0xad0   : > { %v1945_v62 = vpop.eup %1944 }
 0xad1   : > { %v1137_v63 = vmul.f32 %v1945_v62, %v1105_v17  ;;  %v1902_v17 = vld [vmem:[%s2381_s19 + $0x10] sm:$0xff]   ;;  %v1351_v62 = vsub.s32 7, %v2424_v45 }
 0xad2   : > { %v1947_v40 = vpop.eup %1946  ;;  %1798 = vmatprep.subr.bf16.mxu1 %v1902_v17 }
 0xad3   : > { %v1138_v0 = vmul.f32 %v1947_v40, %v1106_v20  ;;  %v1145_v46 = vmul.f32 %v1144_v61, %v1137_v63  ;;  %1799 = vmatpush3.bf16.msra.mxu1 %v1902_v17  ;;  %v1166_v20 = vrot.slane %v2428_v49, %v1165_v19  ;;  %v1352_v63 = vrot.slane %v2428_v49, %v1351_v62 }
 0xad4   : > { %v1949_v43 = vpop.eup %1948  ;;  %1800 = vmatprep.subr.bf16.mxu1 %v1903_v18 }
 0xad5   : > { %v1139_v1 = vmul.f32 %v1949_v43, %v1107_v24  ;;  %v1146_v2 = vmul.f32 %v1144_v61, %v1138_v0  ;;  %v1153_v3 = vadd.f32 %v1152_v37, %v1145_v46 }
 0xad7   : > { %v1154_v7 = vadd.f32 %v1152_v37, %v1146_v2  ;;  %v1147_v44 = vmul.f32 %v1144_v61, %v1139_v1  ;;  %1801 = vmatpush3.bf16.msra.mxu1 %v1903_v18 }
 0xad8   : > { %v1951_v8 = vpop.eup %1950 }
 0xad9   : > { %v1140_v10 = vmul.f32 %v1951_v8, %v1108_v30  ;;  %v1157_v13 = vpack.c.bf16 %v1154_v7, %v1153_v3  ;;  %v1155_v14 = vadd.f32 %v1152_v37, %v1147_v44 }
 0xadb   : > { %v1148_v5 = vmul.f32 %v1144_v61, %v1140_v10  ;;  %1790 = vmatprep.mubr.msk.bf16.mxu0 %vm476_vm1, %v1157_v13 }
 0xadd   : > { %v1156_v6 = vadd.f32 %v1152_v37, %v1148_v5 }
 0xadf   : > { %v1158_v9 = vpack.c.bf16 %v1156_v6, %v1155_v14 }
 0xae1   : > { %1791 = vmatmul.mubr.msk.bf16.vlgmr.msra.gmra.mrb[12].mxu0 %vm476_vm1, %v1158_v9 }
 0xbb4   : > { %v1792_v21 = vpop.f32.mrb[12].mxu0 }
 0xbb5   : > { %v1228_v22 = vadd.f32 %v1792_v21, %v1166_v20  ;;  %v1219_v24 = vpop.f32.mrb[13].mxu0 }
 0xbb6   : > { %v1220_v25 = vadd.f32 %v1219_v24, %v1166_v20  ;;  %v1793_v27 = vpop.f32.mrb[14].mxu0 }
 0xbb7   : > { %v1241_v23 = vmul.f32 0.70710677, %v1228_v22  ;;  %v1231_v28 = vadd.f32 %v1793_v27, %v1166_v20  ;;  %v1222_v26 = vpop.f32.mrb[15].mxu0  ;;  %v1236_v50 = vmul.f32 0.5, %v1228_v22 }
 0xbb8   : > { %v1239_v29 = vmul.f32 0.70710677, %v1220_v25  ;;  %v1223_v30 = vadd.f32 %v1222_v26, %v1166_v20  ;;  %v1234_v54 = vmul.f32 0.5, %v1220_v25 }
 0xbb9   : > { %1952 = verf.f32 %v1241_v23  ;;  %v1242_v31 = vmul.f32 0.70710677, %v1231_v28  ;;  %v1237_v51 = vmul.f32 0.5, %v1231_v28 }
 0xbba   : > { %1954 = verf.f32 %v1239_v29  ;;  %v1240_v32 = vmul.f32 0.70710677, %v1223_v30  ;;  %v1235_v55 = vmul.f32 0.5, %v1223_v30  ;;  %v1960_v29 = vld [vmem:[%s2669_s8] sm:$0xff] (!%p1687_p0)   ;;  %v1961_v30 = vld [vmem:[%s2669_s8 + $0x8] sm:$0xff] (!%p1687_p0)  }
 0xbbb   : > { %1956 = verf.f32 %v1242_v31  ;;  %1806 = vmatprep.subr.bf16.mxu0 (!%p1687_p0), %v1960_v29 }
 0xbbc   : > { %1958 = verf.f32 %v1240_v32  ;;  %1807 = vmatpush3.bf16.msra.mxu0 (!%p1687_p0), %v1960_v29 }
 0xbbd   : > { %1808 = vmatprep.subr.bf16.mxu0 (!%p1687_p0), %v1961_v30 }
 0xbc0   : > { %1809 = vmatpush3.bf16.msra.mxu0 (!%p1687_p0), %v1961_v30 }
 0xbc3   : > { %v1953_v34 = vpop.eup %1952 }
 0xbc4   : > { %v1955_v35 = vpop.eup %1954  ;;  %v1249_v38 = vadd.f32 1.0, %v1953_v34 }
 0xbc5   : > { %v1957_v39 = vpop.eup %1956  ;;  %v1247_v41 = vadd.f32 1.0, %v1955_v35 }
 0xbc6   : > { %v1959_v47 = vpop.eup %1958  ;;  %v1250_v52 = vadd.f32 1.0, %v1957_v39  ;;  %v1253_v57 = vmul.f32 %v1249_v38, %v1236_v50 }
 0xbc7   : > { %v1248_v56 = vadd.f32 1.0, %v1959_v47  ;;  %v1251_v59 = vmul.f32 %v1247_v41, %v1234_v54 }
 0xbc8   : > { %v1254_v58 = vmul.f32 %v1250_v52, %v1237_v51 }
 0xbc9   : > { %v1252_v60 = vmul.f32 %v1248_v56, %v1235_v55  ;;  %v1365_v55 = vld [vmem:[%s2668_s7] sm:$0xff] (!%p1687_p0) }
 0xbca   : > { %v1256_v61 = vpack.c.bf16 %v1254_v58, %v1253_v57  ;;  %v1421_v58 = vrot.slane (!%p1687_p0), %v1365_v55, %v532_v48  ;;  %v1429_v62 = vrot.slane (!%p1687_p0), %v1365_v55, %v540_v53 }
 0xbcb   : > { %v1255_v33 = vpack.c.bf16 %v1252_v60, %v1251_v59 }
 0xbcd   : > { %1802 = vmatprep.mubr.msk.bf16.mxu1 %vm1289_vm3, %v1255_v33 }
 0xbce   : > { %1803 = vmatmul.mubr.msk.bf16.vlgmr.msra.gmra.mrb[12].mxu1 %vm1289_vm3, %v1256_v61 }
 0xca1   : > { %v1804_v40 = vpop.f32.mrb[12].mxu1 }
 0xca2   : > { %v1347_v0 = vadd.f32 %v1804_v40, %v2552_v42  ;;  %v1330_v46 = vpop.f32.mrb[13].mxu1 }
 0xca3   : > { %v1345_v37 = vadd.f32 %v1330_v46, %v2549_v36  ;;  %v1805_v43 = vpop.f32.mrb[14].mxu1  ;;  %1364 = sbr.rel (%p1687_p0) target bundleno = 3780 (0xec4), region = 76 }
 0xca4   : > { %v1355_v1 = vadd.f32 %v1352_v63, %v1347_v0  ;;  %v1348_v2 = vadd.f32 %v1805_v43, %v2561_v4  ;;  %v1333_v3 = vpop.f32.mrb[15].mxu1 }
 0xca5   : > { %v1353_v7 = vadd.f32 %v1352_v63, %v1345_v37  ;;  %v1346_v8 = vadd.f32 %v1333_v3, %v2555_v12 }
 0xca6   : > { %1359 = vst.msk [vmem:[#allocation2 + $0x10] sm:$0xff] %vm476_vm1, %v1355_v1  ;;  %v1356_v44 = vadd.f32 %v1352_v63, %v1348_v2  ;;  %v1372_v42 = vsel (!%p1687_p0), %vm476_vm1, %v1355_v1, 0.0 }
 0xca7   : > { %1357 = vst.msk [vmem:[#allocation2] sm:$0xff] %vm476_vm1, %v1353_v7  ;;  %v1354_v49 = vadd.f32 %v1352_v63, %v1346_v8  ;;  %v1366_v36 = vsel (!%p1687_p0), %vm476_vm1, %v1353_v7, 0.0  ;;  %1373 = vadd.xlane.f32.xlu1 (!%p1687_p0), %v1372_v42 }
 0xca8   : > { %1360 = vst.msk [vmem:[#allocation2 + $0x18] sm:$0xff] %vm476_vm1, %v1356_v44  ;;  %1367 = vadd.xlane.f32.xlu0 (!%p1687_p0), %v1366_v36  ;;  %v1375_v4 = vsel (!%p1687_p0), %vm476_vm1, %v1356_v44, 0.0 }
 0xca9   : > { %1358 = vst.msk [vmem:[#allocation2 + $0x8] sm:$0xff] %vm476_vm1, %v1354_v49  ;;  %v1369_v12 = vsel (!%p1687_p0), %vm476_vm1, %v1354_v49, 0.0 }
 0xcab   : > { %1376 = vadd.xlane.f32.xlu1 %v1375_v4 }
 0xcac   : > { %1370 = vadd.xlane.f32.xlu0 %v1369_v12 }
 0xd34   : > { %v1374_v13 = vpop.xlane.xlu1 %1373 }
 0xd35   : > { %v1368_v10 = vpop.xlane.xlu0 %1367  ;;  %v1380_v14 = vmul.f32 0.03125, %v1374_v13 }
 0xd36   : > { %v1378_v5 = vmul.f32 0.03125, %v1368_v10 }
 0xd37   : > { %v1384_v9 = vsub.f32 %v1355_v1, %v1380_v14 }
 0xd38   : > { %v1382_v6 = vsub.f32 %v1353_v7, %v1378_v5  ;;  %v1377_v16 = vpop.xlane.xlu1 %1376 }
 0xd39   : > { %v1371_v15 = vpop.xlane.xlu0 %1370  ;;  %v1381_v18 = vmul.f32 0.03125, %v1377_v16  ;;  %v1388_v20 = vmul.f32 %v1384_v9, %v1384_v9 }
 0xd3a   : > { %v1379_v17 = vmul.f32 0.03125, %v1371_v15  ;;  %v1386_v19 = vmul.f32 %v1382_v6, %v1382_v6 }
 0xd3b   : > { %v1385_v22 = vsub.f32 %v1356_v44, %v1381_v18  ;;  %v1396_v25 = vsel %vm476_vm1, %v1388_v20, 0.0  ;;  %v1443_v44 = vrot.slane %v1365_v55, %v554_v11 }
 0xd3c   : > { %v1383_v21 = vsub.f32 %v1354_v49, %v1379_v17  ;;  %v1390_v24 = vsel %vm476_vm1, %v1386_v19, 0.0 }
 0xd3d   : > { %1391 = vadd.xlane.f32.xlu0 %v1390_v24  ;;  %v1389_v23 = vmul.f32 %v1385_v22, %v1385_v22 }
 0xd3e   : > { %v1387_v27 = vmul.f32 %v1383_v21, %v1383_v21 }
 0xd3f   : > { %v1399_v26 = vsel %vm476_vm1, %v1389_v23, 0.0 }
 0xd40   : > { %v1393_v28 = vsel %vm476_vm1, %v1387_v27, 0.0 }
 0xd41   : > { %1397 = vadd.xlane.f32.xlu0 %v1396_v25  ;;  %1394 = vadd.xlane.f32.xlu1 %v1393_v28 }
 0xd45   : > { %1400 = vadd.xlane.f32.xlu1 %v1399_v26 }
 0xdca   : > { %v1392_v31 = vpop.xlane.xlu0 %1391 }
 0xdcb   : > { %v1402_v32 = vmul.f32 0.03125, %v1392_v31 }
 0xdcd   : > { %v1406_v34 = vadd.f32 1e-06, %v1402_v32 }
 0xdce   : > { %v1395_v35 = vpop.xlane.xlu1 %1394  ;;  %v1398_v38 = vpop.xlane.xlu0 %1397 }
 0xdcf   : > { %1962 = vrsqrt.f32 %v1406_v34  ;;  %v1403_v39 = vmul.f32 0.03125, %v1395_v35  ;;  %v1404_v41 = vmul.f32 0.03125, %v1398_v38 }
 0xdd1   : > { %v1407_v47 = vadd.f32 1e-06, %v1403_v39  ;;  %v1408_v50 = vadd.f32 1e-06, %v1404_v41 }
 0xdd2   : > { %v1401_v51 = vpop.xlane.xlu1 %1400 }
 0xdd3   : > { %1964 = vrsqrt.f32 %v1407_v47  ;;  %v1405_v52 = vmul.f32 0.03125, %v1401_v51 }
 0xdd4   : > { %1966 = vrsqrt.f32 %v1408_v50 }
 0xdd5   : > { %v1409_v54 = vadd.f32 1e-06, %v1405_v52 }
 0xdd7   : > { %1968 = vrsqrt.f32 %v1409_v54 }
 0xdd9   : > { %v1963_v56 = vpop.eup %1962 }
 0xdda   : > { %v1414_v57 = vmul.f32 %v1963_v56, %v1382_v6 }
 0xddc   : > { %v1422_v33 = vmul.f32 %v1421_v58, %v1414_v57 }
 0xddd   : > { %v1965_v59 = vpop.eup %1964 }
 0xdde   : > { %v1967_v60 = vpop.eup %1966  ;;  %v1415_v61 = vmul.f32 %v1965_v59, %v1383_v21  ;;  %v1430_v46 = vadd.f32 %v1429_v62, %v1422_v33 }
 0xddf   : > { %v1416_v63 = vmul.f32 %v1967_v60, %v1384_v9 }
 0xde0   : > { %v1423_v40 = vmul.f32 %v1421_v58, %v1415_v61 }
 0xde1   : > { %v1969_v0 = vpop.eup %1968  ;;  %v1424_v1 = vmul.f32 %v1421_v58, %v1416_v63 }
 0xde2   : > { %v1431_v37 = vadd.f32 %v1429_v62, %v1423_v40  ;;  %v1417_v43 = vmul.f32 %v1969_v0, %v1385_v22 }
 0xde3   : > { %v1432_v7 = vadd.f32 %v1429_v62, %v1424_v1 }
 0xde4   : > { %v1434_v2 = vpack.c.bf16 %v1431_v37, %v1430_v46  ;;  %v1425_v3 = vmul.f32 %v1421_v58, %v1417_v43 }
 0xde6   : > { %1810 = vmatprep.mubr.msk.bf16.mxu0 %vm476_vm1, %v1434_v2  ;;  %v1433_v48 = vadd.f32 %v1429_v62, %v1425_v3 }
 0xde8   : > { %v1435_v8 = vpack.c.bf16 %v1433_v48, %v1432_v7 }
 0xdea   : > { %1811 = vmatmul.mubr.msk.bf16.vlgmr.msra.gmra.mrb[0].mxu0 %vm476_vm1, %v1435_v8 }
 0xebd   : > { %v1812_v53 = vpop.f32.mrb[0].mxu0 }
 0xebe   : > { %v1505_v49 = vadd.f32 %v1812_v53, %v1443_v44  ;;  %v1496_v36 = vpop.f32.mrb[1].mxu0 }
 0xebf   : > { %v1497_v42 = vadd.f32 %v1496_v36, %v1443_v44  ;;  %v1813_v12 = vpop.f32.mrb[2].mxu0 }
 0xec0   : > { %1513 = vst [vmem:[#allocation9 + $0x10] sm:$0xff] %v1505_v49  ;;  %v1508_v4 = vadd.f32 %v1813_v12, %v1443_v44  ;;  %v1499_v10 = vpop.f32.mrb[3].mxu0 }
 0xec1   : > { %1511 = vst [vmem:[#allocation9] sm:$0xff] %v1497_v42  ;;  %v1500_v13 = vadd.f32 %v1499_v10, %v1443_v44 }
 0xec2   : > { %1514 = vst [vmem:[#allocation9 + $0x18] sm:$0xff] %v1508_v4 }
 0xec3   : > { %1512 = vst [vmem:[#allocation9 + $0x8] sm:$0xff] %v1500_v13 }
 0xec4 PF: > { %p1839_p7 = scmp.eq.s32.totalorder %s2213_s13, 1  ;;  %s2141_s24 = smov [#allocation9]  }
 0xec5   : > { %s1521_s11 = sshll.u32 %s2141_s24, 4  ;;  %s1522_s11 = int_to_ptr.vmem [resolvable:$true] %s1521_s11 }
 0xec6   : > { %s2060_s16 = scalar_lea.vmem %s1522_s11, 512  ;;  %p2067_p5 = scmp.lt.s32.totalorder %s1522_s11, %s1522_s11 }
 0xec7   : > { %p2061_p12 = scmp.ne.s32.totalorder %s1522_s11, %s2060_s16  ;;  %p2068_p4 = scmp.lt.s32.totalorder %s2060_s16, %s2060_s16 }
 0xec9   : > { %p2062_p2 = pnand %p2061_p12, %p1839_p7  ;;  %p2069_p9 = por %p2068_p4, %p2067_p5 }
 0xecb   : > { %p2063_p3 = pneg %p2062_p2 }
 0xecd   : > { %p2070_p8 = pnand %p2069_p9, %p2063_p3 }
 0xecf   : > { %2073 = shalt.err (!%p2070_p8)
}
 0xed0   : > { %s2074_s28 = scalar_lea.hbm %s2670_s9, 512 }
 0xed1   : > { %p2075_p1 = scmp.ne.s32.totalorder %s2670_s9, %s2074_s28  ;;  %p2080_p6 = scmp.lt.u32.totalorder %s2074_s28, %s2670_s9 }
 0xed3   : > { %p2076_p10 = pnand %p2075_p1, %p1839_p7 }
 0xed5   : > { %p2077_p11 = pneg %p2076_p10 }
 0xed7   : > { %p2082_p13 = pnand %p2080_p6, %p2077_p11 }
 0xed9   : > { %2085 = shalt.err (!%p2082_p13)
}
 0xeda   : > { %s2142_s25 = smov 128   ;;  %s2143_s15 = smov 8  }
 0xedb   : > { %1825 = dma.vmem_to_hbm [thread:$0]  (%p1839_p7), %s1522_s11, 512, %s2670_s9, [#allocation5], %s2142_s25, %s2142_s25, %s2143_s15  }
 0xedc   : > { %2111 = dma.done.wait (%p1839_p7), [#allocation5], 512  }
 0xedd   : > { %2113 = vsyncadd (%p1839_p7), [#allocation5], 4294966784 }
 0xede PF: > { %s2695_s12 = sld [smem:[#allocation14_spill]]  ;;  %s2696_s29 = sld [smem:[#allocation13_spill]] }
 0xedf   : > { %s2697_s11 = sld [smem:[#allocation15_spill]]  ;;  %s2698_s30 = smov %s2120_s10 }
 0xee4   : > { %p23_p0 = scmp.ge.s32.totalorder %s2695_s12, 4   ;;  %s2699_s10 = smov %s2696_s29 }
 0xee6   :  { %25 = sbr.rel (!%p23_p0) target bundleno = 8 (0x8), region = 131 }
 0xeed   :  { %1537 = vsyncpa [#allocation4], 1 }
 0xeee   :  { %1539 = vsyncpa [#allocation4 + $0x1], 1 }
 0xeef   :  { %1540 = vsyncpa [#allocation7], 1 }
 0xef0   :  { %1542 = vsyncpa [#allocation7 + $0x1], 1 }
 0xef1   :  { %1543 = vsyncpa [#allocation5], 1 }
 0xef2   :  { %1545 = vsyncpa [#allocation5 + $0x1], 1 }

</bundles_post_ra>
